<compile_context>
chip_gen: v6e
topology: v6e:2x2x1
jax: 0.10.0
libtpu: 0.0.40
codegen_flags: <defaults>
</compile_context>

<pallas_src>
import functools

import numpy as np
import jax
import jax.numpy as jnp
from jax.experimental import pallas as pl
from jax.experimental.pallas import tpu as pltpu


# --------------------------------------------------------------------------
# Pallas kernel: full GIN forward for one block-diagonal graph batch.
#   adj  : (1, N, N)   bf16, A + (1+eps)*I for this batch's graphs
#   x    : (1, N, Cin) bf16 node features
#   pool : (1, G, N)   bf16 global_add_pool matrix
#   per-GIN-layer MLP params (w1, b1, w2, b2) x 3, then lin1 / lin2 (padded).
#   out  : (1, G, 128) f32, lane 0 holds the real logit.
# --------------------------------------------------------------------------
def gin_net_kernel(adj_ref, x_ref, pool_ref,
                   w11, b11, w12, b12,
                   w21, b21, w22, b22,
                   w31, b31, w32, b32,
                   lw1, lb1, lw2, lb2,
                   out_ref):
    adj = adj_ref[0]                      # (N, N) bf16
    x = x_ref[0]                          # (N, Cin) bf16

    # GIN layer 1:  MLP(adj_hat @ x) with the first matmul re-associated:
    # (adj @ x) @ W11 == adj @ (x @ W11); project Cin -> dim first so the
    # (N, N) matmul produces a lane-dense (N, dim) result.
    h = jnp.dot(x, w11[...], preferred_element_type=jnp.float32)          # (N, dim)
    h = jnp.dot(adj, h.astype(jnp.bfloat16),
                preferred_element_type=jnp.float32) + b11[...]
    h = jnp.maximum(h, 0.0).astype(jnp.bfloat16)                          # ReLU on f32
    h = jnp.dot(h, w12[...], preferred_element_type=jnp.float32) + b12[...]
    h = jnp.maximum(h, 0.0).astype(jnp.bfloat16)

    def gin_layer(h, w1, b1, w2, b2):
        # GINConv: MLP((1+eps)*x_i + sum_{j in N(i)} x_j) == MLP(adj_hat @ h)
        agg = jnp.dot(adj, h, preferred_element_type=jnp.float32).astype(jnp.bfloat16)
        h1 = jnp.dot(agg, w1[...], preferred_element_type=jnp.float32) + b1[...]
        h1 = jnp.maximum(h1, 0.0).astype(jnp.bfloat16)
        h2 = jnp.dot(h1, w2[...], preferred_element_type=jnp.float32) + b2[...]
        return jnp.maximum(h2, 0.0).astype(jnp.bfloat16)

    h = gin_layer(h, w21, b21, w22, b22)
    h = gin_layer(h, w31, b31, w32, b32)

    # global_add_pool: (G, N) @ (N, dim)
    pooled = jnp.dot(pool_ref[0], h, preferred_element_type=jnp.float32)

    # lin1 -> relu -> lin2 (lin2 zero-padded to 128 output lanes -> unmasked stores)
    z = jnp.dot(pooled.astype(jnp.bfloat16), lw1[...],
                preferred_element_type=jnp.float32) + lb1[...]
    z = jnp.maximum(z, 0.0).astype(jnp.bfloat16)
    out = jnp.dot(z, lw2[...], preferred_element_type=jnp.float32) + lb2[...]
    out_ref[0] = out


# --------------------------------------------------------------------------
# Host-side precompute (NOT inside the jitted forward): dense adjacency /
# pooling matrices, block-diagonal batching, bf16 casts.
# --------------------------------------------------------------------------
def build_adj_hat(edge_index, num_nodes, eps=0.0):
    src, dst = edge_index[0], edge_index[1]
    adj = jnp.zeros((num_nodes, num_nodes), jnp.float32)
    adj = adj.at[dst, src].add(1.0)                                  # message src -> dst
    adj = adj + (1.0 + eps) * jnp.eye(num_nodes, dtype=jnp.float32)  # GIN self term
    return adj


def build_pool(batch, num_graphs, num_nodes):
    pool = jnp.zeros((num_graphs, num_nodes), jnp.float32)
    pool = pool.at[batch, jnp.arange(num_nodes)].set(1.0)
    return pool


def prep_operands(x, edge_index, batch, num_graphs, num_batches):
    """Build batched bf16 operands once, outside the per-forward path.

    Graphs must be ordered so batch b owns contiguous node rows and graph ids,
    and edges must never cross batch boundaries; these invariants are CHECKED
    here (perf-review correctness concern #3).
    """
    n = x.shape[0]
    assert n % num_batches == 0 and num_graphs % num_batches == 0
    npb = n // num_batches
    gpb = num_graphs // num_batches

    batch_np = np.asarray(batch)
    edge_np = np.asarray(edge_index)
    assert np.all(np.diff(batch_np) >= 0), "graph ids must be sorted (batch-major)"
    assert np.array_equal(batch_np // gpb, np.arange(n) // npb), \
        "node rows must align with the block-diagonal batch blocks"
    assert np.array_equal(edge_np[0] // npb, edge_np[1] // npb), \
        "edges must not cross batch boundaries"

    adj = build_adj_hat(edge_index, n)
    pool = build_pool(batch, num_graphs, n)
    adj_b = jnp.stack([adj[b * npb:(b + 1) * npb, b * npb:(b + 1) * npb]
                       for b in range(num_batches)])
    pool_b = jnp.stack([pool[b * gpb:(b + 1) * gpb, b * npb:(b + 1) * npb]
                        for b in range(num_batches)])
    x_b = x.reshape(num_batches, npb, -1)
    return (adj_b.astype(jnp.bfloat16),
            x_b.astype(jnp.bfloat16),
            pool_b.astype(jnp.bfloat16))


def init_linear(key, fan_in, fan_out):
    # Matches torch.nn.Linear default init: U(-1/sqrt(fan_in), 1/sqrt(fan_in)).
    # Stored as (in, out) so the kernel computes x @ W + b.
    kw, kb = jax.random.split(key)
    bound = 1.0 / jnp.sqrt(jnp.asarray(fan_in, jnp.float32))
    w = jax.random.uniform(kw, (fan_in, fan_out), jnp.float32, -bound, bound)
    b = jax.random.uniform(kb, (1, fan_out), jnp.float32, -bound, bound)
    return w, b


def init_params(key, in_channels, dim):
    keys = jax.random.split(key, 8)
    params = []
    params += list(init_linear(keys[0], in_channels, dim))   # conv1 MLP lin1
    params += list(init_linear(keys[1], dim, dim))           # conv1 MLP lin2
    params += list(init_linear(keys[2], dim, dim))           # conv2 MLP lin1
    params += list(init_linear(keys[3], dim, dim))           # conv2 MLP lin2
    params += list(init_linear(keys[4], dim, dim))           # conv3 MLP lin1
    params += list(init_linear(keys[5], dim, dim))           # conv3 MLP lin2
    params += list(init_linear(keys[6], dim, dim))           # lin1
    params += list(init_linear(keys[7], dim, 1))             # lin2
    return params


def pack_kernel_params(params_f32, out_lanes=128):
    """Weights -> bf16 (MXU-native), biases stay f32; the final dim->1 projection
    is zero-padded to `out_lanes` output columns for lane-dense kernel stores."""
    pairs = [(params_f32[i], params_f32[i + 1]) for i in range(0, len(params_f32), 2)]
    packed = []
    for idx, (w, b) in enumerate(pairs):
        if idx == len(pairs) - 1:  # lin2: pad 1 -> out_lanes output columns
            w = jnp.zeros((w.shape[0], out_lanes), w.dtype).at[:, :w.shape[1]].set(w)
            b = jnp.zeros((1, out_lanes), b.dtype).at[:, :b.shape[1]].set(b)
        packed.append(w.astype(jnp.bfloat16))
        packed.append(b)                                      # bias stays f32
    return packed


def tensorcores_per_chip():
    """Crude chip detection: v7x exposes two TensorCores per chip; v5e/v6e one."""
    try:
        kind = jax.devices()[0].device_kind.lower()
    except Exception:
        return 1
    return 2 if "7" in kind else 1


# --------------------------------------------------------------------------
# Jitted forward: one pallas_call over a (possibly single-step) grid of
# block-diagonal graph batches.
# --------------------------------------------------------------------------
@functools.partial(jax.jit, static_argnames=("dim_sems",))
def gin_net_forward(adj_b, x_b, pool_b, kernel_params, *, dim_sems):
    num_batches, n_b, _ = adj_b.shape
    g_b = pool_b.shape[1]
    cin = x_b.shape[-1]
    dim = kernel_params[0].shape[1]          # w11: (cin, dim)
    out_lanes = kernel_params[-2].shape[1]   # padded lin2: (dim, 128)

    # Advisory cost estimate so XLA schedules sensibly around this tiny call.
    flops_per_batch = 2 * (
        n_b * cin * dim                      # x @ W11
        + 3 * n_b * n_b * dim                # adj @ h, three GIN layers
        + 5 * n_b * dim * dim                # the five (N,dim)x(dim,dim) MLP matmuls
        + g_b * n_b * dim                    # pool @ h
        + g_b * dim * dim                    # lin1
        + g_b * dim * out_lanes)             # lin2 (padded)
    bytes_accessed = (
        adj_b.size * adj_b.dtype.itemsize
        + x_b.size * x_b.dtype.itemsize
        + pool_b.size * pool_b.dtype.itemsize
        + sum(int(p.size) * p.dtype.itemsize for p in kernel_params)
        + num_batches * g_b * out_lanes * 4)
    cost = pl.CostEstimate(flops=int(num_batches * flops_per_batch),
                           transcendentals=0,
                           bytes_accessed=int(bytes_accessed))

    def full_block(shape):
        return pl.BlockSpec(shape, lambda i: (0, 0))

    param_specs = [full_block(p.shape) for p in kernel_params]

    out = pl.pallas_call(
        gin_net_kernel,
        grid=(num_batches,),
        out_shape=jax.ShapeDtypeStruct((num_batches, g_b, out_lanes), jnp.float32),
        in_specs=[
            pl.BlockSpec((1, n_b, n_b), lambda i: (i, 0, 0)),
            pl.BlockSpec((1, n_b, cin), lambda i: (i, 0, 0)),
            pl.BlockSpec((1, g_b, n_b), lambda i: (i, 0, 0)),
        ] + param_specs,
        out_specs=pl.BlockSpec((1, g_b, out_lanes), lambda i: (i, 0, 0)),
        compiler_params=pltpu.CompilerParams(dimension_semantics=dim_sems),
        cost_estimate=cost,
    )(adj_b, x_b, pool_b, *kernel_params)

    # Lane 0 carries the real logit; reshape to (total_graphs, 1).
    return out[:, :, 0].reshape(num_batches * g_b, 1)


# Pure-JAX f32 reference (scatter-based aggregation) for correctness checking.
def gin_net_reference(x, edge_index, batch, params, num_graphs):
    (w11, b11, w12, b12,
     w21, b21, w22, b22,
     w31, b31, w32, b32,
     lw1, lb1, lw2, lb2) = params
    src, dst = edge_index[0], edge_index[1]

    def layer(h, w1, b1, w2, b2):
        agg = jnp.zeros_like(h).at[dst].add(h[src]) + h          # eps = 0
        h1 = jnp.maximum(agg @ w1 + b1, 0.0)
        return jnp.maximum(h1 @ w2 + b2, 0.0)

    h = x.astype(jnp.float32)
    h = layer(h, w11, b11, w12, b12)
    h = layer(h, w21, b21, w22, b22)
    h = layer(h, w31, b31, w32, b32)
    pooled = jnp.zeros((num_graphs, h.shape[1]), jnp.float32).at[batch].add(h)
    h = jnp.maximum(pooled @ lw1 + lb1, 0.0)
    return h @ lw2 + lb2


if __name__ == "__main__":
    IN_CHANNELS = 4
    DIM = 32
    NODES_PER_GRAPH = 8
    NUM_GRAPHS = 32                          # 32 graphs x 8 nodes = 256 nodes total
    NUM_NODES = NUM_GRAPHS * NODES_PER_GRAPH

    # Batching strategy (perf review):
    #   * single-TC chips (v5e/v6e): ONE 256-node block-diagonal batch, grid=(1,)
    #     (fills the 256-deep MXU contraction, no per-step grid overhead).
    #   * two-TC chips (v7x): two 128-node batches, one per TensorCore.
    # Scale-up note: if NUM_GRAPHS grows, grow graphs-per-batch (nodes per grid
    # step, up to ~512-1024 nodes) before growing the grid.
    NUM_BATCHES = 2 if tensorcores_per_chip() == 2 else 1
    GRAPHS_PER_BATCH = NUM_GRAPHS // NUM_BATCHES

    key = jax.random.PRNGKey(0)
    k_x, k_p = jax.random.split(key)

    # Node features.
    x = jax.random.normal(k_x, (NUM_NODES, IN_CHANNELS), jnp.float32)

    # Bidirectional ring graphs of 8 nodes each, numbered contiguously (deterministic).
    srcs, dsts = [], []
    for g in range(NUM_GRAPHS):
        base = g * NODES_PER_GRAPH
        for i in range(NODES_PER_GRAPH):
            a = base + i
            b = base + (i + 1) % NODES_PER_GRAPH
            srcs += [a, b]
            dsts += [b, a]
    edge_index = jnp.array([srcs, dsts], dtype=jnp.int32)          # (2, 512)
    batch = jnp.repeat(jnp.arange(NUM_GRAPHS, dtype=jnp.int32), NODES_PER_GRAPH)

    params_f32 = init_params(k_p, IN_CHANNELS, DIM)
    kernel_params = tuple(pack_kernel_params(params_f32))

    # Precompute dense batched operands OUTSIDE the per-forward path.
    adj_b, x_b, pool_b = prep_operands(x, edge_index, batch, NUM_GRAPHS, NUM_BATCHES)

    # Dimension semantics: on the multi-batch (v7x) path request explicit
    # per-TensorCore sharding; fall back to plain "parallel" if rejected.
    if NUM_BATCHES > 1:
        core_parallel = getattr(pltpu, "CORE_PARALLEL", "parallel")
        sems_options = ((core_parallel,), ("parallel",))
    else:
        sems_options = (("arbitrary",),)

    out, last_err = None, None
    for sems in sems_options:
        try:
            out = jax.block_until_ready(
                gin_net_forward(adj_b, x_b, pool_b, kernel_params, dim_sems=sems))
            break
        except Exception as e:               # fall back to next semantics option
            last_err = e
    if out is None:
        raise last_err

    ref = gin_net_reference(x, edge_index, batch, params_f32, NUM_GRAPHS)
    assert out.shape == (NUM_GRAPHS, 1)
    # bf16 operands with f32 accumulation -> loosened tolerance vs the f32 reference.
    assert jnp.allclose(out, ref, atol=5e-2, rtol=5e-2), (
        float(jnp.max(jnp.abs(out - ref))), out, ref)

    print("KERNEL_OK")
</pallas_src>

<mosaic_0001>
module attributes {stable_mosaic.version = 11 : i64} {
  func.func @gin_net_kernel(%arg0: i32, %arg1: memref<1x256x256xbf16, #tpu.memory_space<vmem>>, %arg2: memref<1x256x4xbf16, #tpu.memory_space<vmem>>, %arg3: memref<1x32x256xbf16, #tpu.memory_space<vmem>>, %arg4: memref<4x32xbf16, #tpu.memory_space<vmem>>, %arg5: memref<1x32xf32, #tpu.memory_space<vmem>>, %arg6: memref<32x32xbf16, #tpu.memory_space<vmem>>, %arg7: memref<1x32xf32, #tpu.memory_space<vmem>>, %arg8: memref<32x32xbf16, #tpu.memory_space<vmem>>, %arg9: memref<1x32xf32, #tpu.memory_space<vmem>>, %arg10: memref<32x32xbf16, #tpu.memory_space<vmem>>, %arg11: memref<1x32xf32, #tpu.memory_space<vmem>>, %arg12: memref<32x32xbf16, #tpu.memory_space<vmem>>, %arg13: memref<1x32xf32, #tpu.memory_space<vmem>>, %arg14: memref<32x32xbf16, #tpu.memory_space<vmem>>, %arg15: memref<1x32xf32, #tpu.memory_space<vmem>>, %arg16: memref<32x32xbf16, #tpu.memory_space<vmem>>, %arg17: memref<1x32xf32, #tpu.memory_space<vmem>>, %arg18: memref<32x128xbf16, #tpu.memory_space<vmem>>, %arg19: memref<1x128xf32, #tpu.memory_space<vmem>>, %arg20: memref<1x32x128xf32, #tpu.memory_space<vmem>>) attributes {dimension_semantics = [#tpu.dimension_semantics<arbitrary>], iteration_bounds = array<i64: 1>, scalar_prefetch = 0 : i64, scratch_operands = 0 : i64, tpu.core_type = #tpu.core_type<tc>, window_params = [{transform_indices = @transform_0, window_bounds = array<i64: 1, 256, 256>}, {transform_indices = @transform_1, window_bounds = array<i64: 1, 256, 4>}, {transform_indices = @transform_2, window_bounds = array<i64: 1, 32, 256>}, {pipeline_mode = #tpu.pipeline_mode<synchronous>, transform_indices = @transform_3, window_bounds = array<i64: 4, 32>}, {pipeline_mode = #tpu.pipeline_mode<synchronous>, transform_indices = @transform_4, window_bounds = array<i64: 1, 32>}, {pipeline_mode = #tpu.pipeline_mode<synchronous>, transform_indices = @transform_5, window_bounds = array<i64: 32, 32>}, {pipeline_mode = #tpu.pipeline_mode<synchronous>, transform_indices = @transform_6, window_bounds = array<i64: 1, 32>}, {pipeline_mode = #tpu.pipeline_mode<synchronous>, transform_indices = @transform_7, window_bounds = array<i64: 32, 32>}, {pipeline_mode = #tpu.pipeline_mode<synchronous>, transform_indices = @transform_8, window_bounds = array<i64: 1, 32>}, {pipeline_mode = #tpu.pipeline_mode<synchronous>, transform_indices = @transform_9, window_bounds = array<i64: 32, 32>}, {pipeline_mode = #tpu.pipeline_mode<synchronous>, transform_indices = @transform_10, window_bounds = array<i64: 1, 32>}, {pipeline_mode = #tpu.pipeline_mode<synchronous>, transform_indices = @transform_11, window_bounds = array<i64: 32, 32>}, {pipeline_mode = #tpu.pipeline_mode<synchronous>, transform_indices = @transform_12, window_bounds = array<i64: 1, 32>}, {pipeline_mode = #tpu.pipeline_mode<synchronous>, transform_indices = @transform_13, window_bounds = array<i64: 32, 32>}, {pipeline_mode = #tpu.pipeline_mode<synchronous>, transform_indices = @transform_14, window_bounds = array<i64: 1, 32>}, {pipeline_mode = #tpu.pipeline_mode<synchronous>, transform_indices = @transform_15, window_bounds = array<i64: 32, 32>}, {pipeline_mode = #tpu.pipeline_mode<synchronous>, transform_indices = @transform_16, window_bounds = array<i64: 1, 32>}, {pipeline_mode = #tpu.pipeline_mode<synchronous>, transform_indices = @transform_17, window_bounds = array<i64: 32, 128>}, {pipeline_mode = #tpu.pipeline_mode<synchronous>, transform_indices = @transform_18, window_bounds = array<i64: 1, 128>}, {transform_indices = @transform_19, window_bounds = array<i64: 1, 32, 128>}]} {
    %c0 = arith.constant 0 : index
    %c0_0 = arith.constant 0 : index
    %c0_1 = arith.constant 0 : index
    %0 = vector.load %arg1[%c0, %c0_0, %c0_1] : memref<1x256x256xbf16, #tpu.memory_space<vmem>>, vector<1x256x256xbf16>
    %1 = vector.shape_cast %0 : vector<1x256x256xbf16> to vector<256x256xbf16>
    %c0_2 = arith.constant 0 : index
    %c0_3 = arith.constant 0 : index
    %c0_4 = arith.constant 0 : index
    %2 = vector.load %arg2[%c0_2, %c0_3, %c0_4] : memref<1x256x4xbf16, #tpu.memory_space<vmem>>, vector<1x256x4xbf16>
    %3 = vector.shape_cast %2 : vector<1x256x4xbf16> to vector<256x4xbf16>
    %c0_5 = arith.constant 0 : index
    %c0_6 = arith.constant 0 : index
    %4 = vector.load %arg4[%c0_5, %c0_6] : memref<4x32xbf16, #tpu.memory_space<vmem>>, vector<4x32xbf16>
    %cst = arith.constant dense<0.000000e+00> : vector<256x32xf32>
    %5 = tpu.matmul %3, %4, %cst {dimension_numbers = #tpu.dot_dimension_numbers<[1], [0], [0], [1], [0, 0, 1, 1], [], []>} : vector<256x4xbf16>, vector<4x32xbf16>, vector<256x32xf32> -> vector<256x32xf32>
    %6 = arith.truncf %5 : vector<256x32xf32> to vector<256x32xbf16>
    %cst_7 = arith.constant dense<0.000000e+00> : vector<256x32xf32>
    %7 = tpu.matmul %1, %6, %cst_7 {dimension_numbers = #tpu.dot_dimension_numbers<[1], [0], [0], [1], [0, 0, 1, 1], [], []>} : vector<256x256xbf16>, vector<256x32xbf16>, vector<256x32xf32> -> vector<256x32xf32>
    %c0_8 = arith.constant 0 : index
    %c0_9 = arith.constant 0 : index
    %8 = vector.load %arg5[%c0_8, %c0_9] : memref<1x32xf32, #tpu.memory_space<vmem>>, vector<1x32xf32>
    %9 = vector.broadcast %8 : vector<1x32xf32> to vector<256x32xf32>
    %10 = arith.addf %7, %9 : vector<256x32xf32>
    %cst_10 = arith.constant 0.000000e+00 : f32
    %11 = vector.broadcast %cst_10 : f32 to vector<256x32xf32>
    %12 = arith.maximumf %10, %11 : vector<256x32xf32>
    %13 = arith.truncf %12 : vector<256x32xf32> to vector<256x32xbf16>
    %c0_11 = arith.constant 0 : index
    %c0_12 = arith.constant 0 : index
    %14 = vector.load %arg6[%c0_11, %c0_12] : memref<32x32xbf16, #tpu.memory_space<vmem>>, vector<32x32xbf16>
    %cst_13 = arith.constant dense<0.000000e+00> : vector<256x32xf32>
    %15 = tpu.matmul %13, %14, %cst_13 {dimension_numbers = #tpu.dot_dimension_numbers<[1], [0], [0], [1], [0, 0, 1, 1], [], []>} : vector<256x32xbf16>, vector<32x32xbf16>, vector<256x32xf32> -> vector<256x32xf32>
    %c0_14 = arith.constant 0 : index
    %c0_15 = arith.constant 0 : index
    %16 = vector.load %arg7[%c0_14, %c0_15] : memref<1x32xf32, #tpu.memory_space<vmem>>, vector<1x32xf32>
    %17 = vector.broadcast %16 : vector<1x32xf32> to vector<256x32xf32>
    %18 = arith.addf %15, %17 : vector<256x32xf32>
    %cst_16 = arith.constant 0.000000e+00 : f32
    %19 = vector.broadcast %cst_16 : f32 to vector<256x32xf32>
    %20 = arith.maximumf %18, %19 : vector<256x32xf32>
    %21 = arith.truncf %20 : vector<256x32xf32> to vector<256x32xbf16>
    %cst_17 = arith.constant dense<0.000000e+00> : vector<256x32xf32>
    %22 = tpu.matmul %1, %21, %cst_17 {dimension_numbers = #tpu.dot_dimension_numbers<[1], [0], [0], [1], [0, 0, 1, 1], [], []>} : vector<256x256xbf16>, vector<256x32xbf16>, vector<256x32xf32> -> vector<256x32xf32>
    %23 = arith.truncf %22 : vector<256x32xf32> to vector<256x32xbf16>
    %c0_18 = arith.constant 0 : index
    %c0_19 = arith.constant 0 : index
    %24 = vector.load %arg8[%c0_18, %c0_19] : memref<32x32xbf16, #tpu.memory_space<vmem>>, vector<32x32xbf16>
    %cst_20 = arith.constant dense<0.000000e+00> : vector<256x32xf32>
    %25 = tpu.matmul %23, %24, %cst_20 {dimension_numbers = #tpu.dot_dimension_numbers<[1], [0], [0], [1], [0, 0, 1, 1], [], []>} : vector<256x32xbf16>, vector<32x32xbf16>, vector<256x32xf32> -> vector<256x32xf32>
    %c0_21 = arith.constant 0 : index
    %c0_22 = arith.constant 0 : index
    %26 = vector.load %arg9[%c0_21, %c0_22] : memref<1x32xf32, #tpu.memory_space<vmem>>, vector<1x32xf32>
    %27 = vector.broadcast %26 : vector<1x32xf32> to vector<256x32xf32>
    %28 = arith.addf %25, %27 : vector<256x32xf32>
    %cst_23 = arith.constant 0.000000e+00 : f32
    %29 = vector.broadcast %cst_23 : f32 to vector<256x32xf32>
    %30 = arith.maximumf %28, %29 : vector<256x32xf32>
    %31 = arith.truncf %30 : vector<256x32xf32> to vector<256x32xbf16>
    %c0_24 = arith.constant 0 : index
    %c0_25 = arith.constant 0 : index
    %32 = vector.load %arg10[%c0_24, %c0_25] : memref<32x32xbf16, #tpu.memory_space<vmem>>, vector<32x32xbf16>
    %cst_26 = arith.constant dense<0.000000e+00> : vector<256x32xf32>
    %33 = tpu.matmul %31, %32, %cst_26 {dimension_numbers = #tpu.dot_dimension_numbers<[1], [0], [0], [1], [0, 0, 1, 1], [], []>} : vector<256x32xbf16>, vector<32x32xbf16>, vector<256x32xf32> -> vector<256x32xf32>
    %c0_27 = arith.constant 0 : index
    %c0_28 = arith.constant 0 : index
    %34 = vector.load %arg11[%c0_27, %c0_28] : memref<1x32xf32, #tpu.memory_space<vmem>>, vector<1x32xf32>
    %35 = vector.broadcast %34 : vector<1x32xf32> to vector<256x32xf32>
    %36 = arith.addf %33, %35 : vector<256x32xf32>
    %cst_29 = arith.constant 0.000000e+00 : f32
    %37 = vector.broadcast %cst_29 : f32 to vector<256x32xf32>
    %38 = arith.maximumf %36, %37 : vector<256x32xf32>
    %39 = arith.truncf %38 : vector<256x32xf32> to vector<256x32xbf16>
    %cst_30 = arith.constant dense<0.000000e+00> : vector<256x32xf32>
    %40 = tpu.matmul %1, %39, %cst_30 {dimension_numbers = #tpu.dot_dimension_numbers<[1], [0], [0], [1], [0, 0, 1, 1], [], []>} : vector<256x256xbf16>, vector<256x32xbf16>, vector<256x32xf32> -> vector<256x32xf32>
    %41 = arith.truncf %40 : vector<256x32xf32> to vector<256x32xbf16>
    %c0_31 = arith.constant 0 : index
    %c0_32 = arith.constant 0 : index
    %42 = vector.load %arg12[%c0_31, %c0_32] : memref<32x32xbf16, #tpu.memory_space<vmem>>, vector<32x32xbf16>
    %cst_33 = arith.constant dense<0.000000e+00> : vector<256x32xf32>
    %43 = tpu.matmul %41, %42, %cst_33 {dimension_numbers = #tpu.dot_dimension_numbers<[1], [0], [0], [1], [0, 0, 1, 1], [], []>} : vector<256x32xbf16>, vector<32x32xbf16>, vector<256x32xf32> -> vector<256x32xf32>
    %c0_34 = arith.constant 0 : index
    %c0_35 = arith.constant 0 : index
    %44 = vector.load %arg13[%c0_34, %c0_35] : memref<1x32xf32, #tpu.memory_space<vmem>>, vector<1x32xf32>
    %45 = vector.broadcast %44 : vector<1x32xf32> to vector<256x32xf32>
    %46 = arith.addf %43, %45 : vector<256x32xf32>
    %cst_36 = arith.constant 0.000000e+00 : f32
    %47 = vector.broadcast %cst_36 : f32 to vector<256x32xf32>
    %48 = arith.maximumf %46, %47 : vector<256x32xf32>
    %49 = arith.truncf %48 : vector<256x32xf32> to vector<256x32xbf16>
    %c0_37 = arith.constant 0 : index
    %c0_38 = arith.constant 0 : index
    %50 = vector.load %arg14[%c0_37, %c0_38] : memref<32x32xbf16, #tpu.memory_space<vmem>>, vector<32x32xbf16>
    %cst_39 = arith.constant dense<0.000000e+00> : vector<256x32xf32>
    %51 = tpu.matmul %49, %50, %cst_39 {dimension_numbers = #tpu.dot_dimension_numbers<[1], [0], [0], [1], [0, 0, 1, 1], [], []>} : vector<256x32xbf16>, vector<32x32xbf16>, vector<256x32xf32> -> vector<256x32xf32>
    %c0_40 = arith.constant 0 : index
    %c0_41 = arith.constant 0 : index
    %52 = vector.load %arg15[%c0_40, %c0_41] : memref<1x32xf32, #tpu.memory_space<vmem>>, vector<1x32xf32>
    %53 = vector.broadcast %52 : vector<1x32xf32> to vector<256x32xf32>
    %54 = arith.addf %51, %53 : vector<256x32xf32>
    %cst_42 = arith.constant 0.000000e+00 : f32
    %55 = vector.broadcast %cst_42 : f32 to vector<256x32xf32>
    %56 = arith.maximumf %54, %55 : vector<256x32xf32>
    %57 = arith.truncf %56 : vector<256x32xf32> to vector<256x32xbf16>
    %c0_43 = arith.constant 0 : index
    %c0_44 = arith.constant 0 : index
    %c0_45 = arith.constant 0 : index
    %58 = vector.load %arg3[%c0_43, %c0_44, %c0_45] : memref<1x32x256xbf16, #tpu.memory_space<vmem>>, vector<1x32x256xbf16>
    %59 = vector.shape_cast %58 : vector<1x32x256xbf16> to vector<32x256xbf16>
    %cst_46 = arith.constant dense<0.000000e+00> : vector<32x32xf32>
    %60 = tpu.matmul %59, %57, %cst_46 {dimension_numbers = #tpu.dot_dimension_numbers<[1], [0], [0], [1], [0, 0, 1, 1], [], []>} : vector<32x256xbf16>, vector<256x32xbf16>, vector<32x32xf32> -> vector<32x32xf32>
    %61 = arith.truncf %60 : vector<32x32xf32> to vector<32x32xbf16>
    %c0_47 = arith.constant 0 : index
    %c0_48 = arith.constant 0 : index
    %62 = vector.load %arg16[%c0_47, %c0_48] : memref<32x32xbf16, #tpu.memory_space<vmem>>, vector<32x32xbf16>
    %cst_49 = arith.constant dense<0.000000e+00> : vector<32x32xf32>
    %63 = tpu.matmul %61, %62, %cst_49 {dimension_numbers = #tpu.dot_dimension_numbers<[1], [0], [0], [1], [0, 0, 1, 1], [], []>} : vector<32x32xbf16>, vector<32x32xbf16>, vector<32x32xf32> -> vector<32x32xf32>
    %c0_50 = arith.constant 0 : index
    %c0_51 = arith.constant 0 : index
    %64 = vector.load %arg17[%c0_50, %c0_51] : memref<1x32xf32, #tpu.memory_space<vmem>>, vector<1x32xf32>
    %65 = vector.broadcast %64 : vector<1x32xf32> to vector<32x32xf32>
    %66 = arith.addf %63, %65 : vector<32x32xf32>
    %cst_52 = arith.constant 0.000000e+00 : f32
    %67 = vector.broadcast %cst_52 : f32 to vector<32x32xf32>
    %68 = arith.maximumf %66, %67 : vector<32x32xf32>
    %69 = arith.truncf %68 : vector<32x32xf32> to vector<32x32xbf16>
    %c0_53 = arith.constant 0 : index
    %c0_54 = arith.constant 0 : index
    %70 = vector.load %arg18[%c0_53, %c0_54] : memref<32x128xbf16, #tpu.memory_space<vmem>>, vector<32x128xbf16>
    %cst_55 = arith.constant dense<0.000000e+00> : vector<32x128xf32>
    %71 = tpu.matmul %69, %70, %cst_55 {dimension_numbers = #tpu.dot_dimension_numbers<[1], [0], [0], [1], [0, 0, 1, 1], [], []>} : vector<32x32xbf16>, vector<32x128xbf16>, vector<32x128xf32> -> vector<32x128xf32>
    %c0_56 = arith.constant 0 : index
    %c0_57 = arith.constant 0 : index
    %72 = vector.load %arg19[%c0_56, %c0_57] : memref<1x128xf32, #tpu.memory_space<vmem>>, vector<1x128xf32>
    %73 = vector.broadcast %72 : vector<1x128xf32> to vector<32x128xf32>
    %74 = arith.addf %71, %73 : vector<32x128xf32>
    %c0_58 = arith.constant 0 : index
    %c0_59 = arith.constant 0 : index
    %c0_60 = arith.constant 0 : index
    %75 = vector.load %arg20[%c0_58, %c0_59, %c0_60] : memref<1x32x128xf32, #tpu.memory_space<vmem>>, vector<1x32x128xf32>
    %76 = vector.shape_cast %75 : vector<1x32x128xf32> to vector<32x128xf32>
    %77 = vector.shape_cast %74 : vector<32x128xf32> to vector<1x32x128xf32>
    tpu.vector_store %arg20[%c0_58, %c0_59, %c0_60], %77 {strides = array<i32>} : memref<1x32x128xf32, #tpu.memory_space<vmem>>, vector<1x32x128xf32>,
    return
  }
  func.func @transform_0(%arg0: i32) -> (i32, i32, i32) {
    %c0_i32 = arith.constant 0 : i32
    %c0_i32_0 = arith.constant 0 : i32
    %c0_i32_1 = arith.constant 0 : i32
    return %arg0, %c0_i32, %c0_i32_0 : i32, i32, i32
  }
  func.func @transform_1(%arg0: i32) -> (i32, i32, i32) {
    %c0_i32 = arith.constant 0 : i32
    %c0_i32_0 = arith.constant 0 : i32
    %c0_i32_1 = arith.constant 0 : i32
    return %arg0, %c0_i32, %c0_i32_0 : i32, i32, i32
  }
  func.func @transform_2(%arg0: i32) -> (i32, i32, i32) {
    %c0_i32 = arith.constant 0 : i32
    %c0_i32_0 = arith.constant 0 : i32
    %c0_i32_1 = arith.constant 0 : i32
    return %arg0, %c0_i32, %c0_i32_0 : i32, i32, i32
  }
  func.func @transform_3(%arg0: i32) -> (i32, i32) {
    %c0_i32 = arith.constant 0 : i32
    %c0_i32_0 = arith.constant 0 : i32
    %c0_i32_1 = arith.constant 0 : i32
    return %c0_i32, %c0_i32_0 : i32, i32
  }
  func.func @transform_4(%arg0: i32) -> (i32, i32) {
    %c0_i32 = arith.constant 0 : i32
    %c0_i32_0 = arith.constant 0 : i32
    %c0_i32_1 = arith.constant 0 : i32
    return %c0_i32, %c0_i32_0 : i32, i32
  }
  func.func @transform_5(%arg0: i32) -> (i32, i32) {
    %c0_i32 = arith.constant 0 : i32
    %c0_i32_0 = arith.constant 0 : i32
    %c0_i32_1 = arith.constant 0 : i32
    return %c0_i32, %c0_i32_0 : i32, i32
  }
  func.func @transform_6(%arg0: i32) -> (i32, i32) {
    %c0_i32 = arith.constant 0 : i32
    %c0_i32_0 = arith.constant 0 : i32
    %c0_i32_1 = arith.constant 0 : i32
    return %c0_i32, %c0_i32_0 : i32, i32
  }
  func.func @transform_7(%arg0: i32) -> (i32, i32) {
    %c0_i32 = arith.constant 0 : i32
    %c0_i32_0 = arith.constant 0 : i32
    %c0_i32_1 = arith.constant 0 : i32
    return %c0_i32, %c0_i32_0 : i32, i32
  }
  func.func @transform_8(%arg0: i32) -> (i32, i32) {
    %c0_i32 = arith.constant 0 : i32
    %c0_i32_0 = arith.constant 0 : i32
    %c0_i32_1 = arith.constant 0 : i32
    return %c0_i32, %c0_i32_0 : i32, i32
  }
  func.func @transform_9(%arg0: i32) -> (i32, i32) {
    %c0_i32 = arith.constant 0 : i32
    %c0_i32_0 = arith.constant 0 : i32
    %c0_i32_1 = arith.constant 0 : i32
    return %c0_i32, %c0_i32_0 : i32, i32
  }
  func.func @transform_10(%arg0: i32) -> (i32, i32) {
    %c0_i32 = arith.constant 0 : i32
    %c0_i32_0 = arith.constant 0 : i32
    %c0_i32_1 = arith.constant 0 : i32
    return %c0_i32, %c0_i32_0 : i32, i32
  }
  func.func @transform_11(%arg0: i32) -> (i32, i32) {
    %c0_i32 = arith.constant 0 : i32
    %c0_i32_0 = arith.constant 0 : i32
    %c0_i32_1 = arith.constant 0 : i32
    return %c0_i32, %c0_i32_0 : i32, i32
  }
  func.func @transform_12(%arg0: i32) -> (i32, i32) {
    %c0_i32 = arith.constant 0 : i32
    %c0_i32_0 = arith.constant 0 : i32
    %c0_i32_1 = arith.constant 0 : i32
    return %c0_i32, %c0_i32_0 : i32, i32
  }
  func.func @transform_13(%arg0: i32) -> (i32, i32) {
    %c0_i32 = arith.constant 0 : i32
    %c0_i32_0 = arith.constant 0 : i32
    %c0_i32_1 = arith.constant 0 : i32
    return %c0_i32, %c0_i32_0 : i32, i32
  }
  func.func @transform_14(%arg0: i32) -> (i32, i32) {
    %c0_i32 = arith.constant 0 : i32
    %c0_i32_0 = arith.constant 0 : i32
    %c0_i32_1 = arith.constant 0 : i32
    return %c0_i32, %c0_i32_0 : i32, i32
  }
  func.func @transform_15(%arg0: i32) -> (i32, i32) {
    %c0_i32 = arith.constant 0 : i32
    %c0_i32_0 = arith.constant 0 : i32
    %c0_i32_1 = arith.constant 0 : i32
    return %c0_i32, %c0_i32_0 : i32, i32
  }
  func.func @transform_16(%arg0: i32) -> (i32, i32) {
    %c0_i32 = arith.constant 0 : i32
    %c0_i32_0 = arith.constant 0 : i32
    %c0_i32_1 = arith.constant 0 : i32
    return %c0_i32, %c0_i32_0 : i32, i32
  }
  func.func @transform_17(%arg0: i32) -> (i32, i32) {
    %c0_i32 = arith.constant 0 : i32
    %c0_i32_0 = arith.constant 0 : i32
    %c0_i32_1 = arith.constant 0 : i32
    return %c0_i32, %c0_i32_0 : i32, i32
  }
  func.func @transform_18(%arg0: i32) -> (i32, i32) {
    %c0_i32 = arith.constant 0 : i32
    %c0_i32_0 = arith.constant 0 : i32
    %c0_i32_1 = arith.constant 0 : i32
    return %c0_i32, %c0_i32_0 : i32, i32
  }
  func.func @transform_19(%arg0: i32) -> (i32, i32, i32) {
    %c0_i32 = arith.constant 0 : i32
    %c0_i32_0 = arith.constant 0 : i32
    %c0_i32_1 = arith.constant 0 : i32
    return %arg0, %c0_i32, %c0_i32_0 : i32, i32, i32
  }
}

</mosaic_0001>

<bundles_post_ra>
// kernel: gin_net_forward.1
= control target key start
LH: loop header
LB: loop body
LE: loop exit
PB: predicated region body
PF: predicated region fallthrough
CT: control target
= control target key end

     0   :  { %s4721_s0 = inlined_call_operand.hbm [shape: bf16[1,256,256], index: 0, kind: input, shape index: {}]   ;;  %s4722_s1 = inlined_call_operand.vmem [shape: bf16[1,256,4], index: 1, kind: input, shape index: {}]   ;;  %s4723_s2 = inlined_call_operand.vmem [shape: bf16[1,32,256], index: 2, kind: input, shape index: {}]   ;;  %s4724_s3 = inlined_call_operand.hbm [shape: bf16[4,32], index: 3, kind: input, shape index: {}]   ;;  %s4725_s4 = inlined_call_operand.hbm [shape: f32[1,32], index: 4, kind: input, shape index: {}]   ;;  %s4726_s5 = inlined_call_operand.vmem [shape: bf16[32,32], index: 5, kind: input, shape index: {}]   ;;  %s4727_s6 = inlined_call_operand.hbm [shape: f32[1,32], index: 6, kind: input, shape index: {}]   ;;  %s4728_s7 = inlined_call_operand.vmem [shape: bf16[32,32], index: 7, kind: input, shape index: {}]   ;;  %s4729_s8 = inlined_call_operand.vmem [shape: f32[1,32], index: 8, kind: input, shape index: {}]   ;;  %s4730_s9 = inlined_call_operand.vmem [shape: bf16[32,32], index: 9, kind: input, shape index: {}]   ;;  %s4731_s10 = inlined_call_operand.vmem [shape: f32[1,32], index: 10, kind: input, shape index: {}]   ;;  %s4732_s11 = inlined_call_operand.vmem [shape: bf16[32,32], index: 11, kind: input, shape index: {}]   ;;  %s4733_s12 = inlined_call_operand.vmem [shape: f32[1,32], index: 12, kind: input, shape index: {}]   ;;  %s4734_s13 = inlined_call_operand.vmem [shape: bf16[32,32], index: 13, kind: input, shape index: {}]   ;;  %s4735_s14 = inlined_call_operand.vmem [shape: f32[1,32], index: 14, kind: input, shape index: {}]   ;;  %s4736_s15 = inlined_call_operand.vmem [shape: bf16[32,32], index: 15, kind: input, shape index: {}]   ;;  %s4737_s16 = inlined_call_operand.vmem [shape: f32[1,32], index: 16, kind: input, shape index: {}]   ;;  %s4738_s17 = inlined_call_operand.vmem [shape: bf16[32,128], index: 17, kind: input, shape index: {}]   ;;  %s4739_s18 = inlined_call_operand.vmem [shape: f32[1,128], index: 18, kind: input, shape index: {}]   ;;  %s4740_s19 = inlined_call_operand.vmem [shape: f32[1,32,128], index: 19, kind: output, shape index: {}]  }
   0x1   :  { %4757 = sst [smem:[#allocation26_spill]] %s4721_s0 }
   0x2   :  { %4758 = sst [smem:[#allocation27_spill]] %s4722_s1 }
   0x3   :  { %4759 = sst [smem:[#allocation28_spill]] %s4723_s2 }
   0x4   :  { %4760 = sst [smem:[#allocation29_spill]] %s4724_s3 }
   0x5   :  { %24 = vsyncpa [#allocation3], 0 }
   0x6   :  { %25 = vsyncpa [#allocation5], 0 }
   0x7   :  { %26 = vsyncpa [#allocation8], 0  ;;  %s3957_s0 = smov [#allocation4]   ;;  %s3958_s20 = smov [#allocation2]  }
   0x8   :  { %s49_s30 = sshll.u32 %s3957_s0, 4  ;;  %s32_s21 = sshll.u32 %s3958_s20, 4  ;;  %s50_s30 = int_to_ptr.vmem [resolvable:$true] %s49_s30  ;;  %s33_s21 = int_to_ptr.vmem [resolvable:$true] %s32_s21 }
   0x9   :  { %s3879_s1 = scalar_lea.vmem %s50_s30, 32  ;;  %p3884_p1 = scmp.lt.s32.totalorder %s50_s30, %s50_s30 }
   0xa   :  { %p3880_p0 = scmp.ne.s32.totalorder %s50_s30, %s3879_s1  ;;  %p3885_p2 = scmp.lt.s32.totalorder %s3879_s1, %s3879_s1 }
   0xc   :  { %p3886_p3 = por %p3885_p2, %p3884_p1 }
   0xe   :  { %p3887_p4 = pnand %p3886_p3, %p3880_p0 }
  0x10   :  { %3890 = shalt.err (!%p3887_p4)
}
  0x11   :  { %s4761_s23 = sld [smem:[#allocation29_spill]]  ;;  %s3899_s24 = scalar_lea.vmem %s33_s21, 4096 }
  0x12   :  { %p3900_p5 = scmp.ne.s32.totalorder %s33_s21, %s3899_s24  ;;  %p3904_p6 = scmp.lt.s32.totalorder %s33_s21, %s33_s21 }
  0x13   :  { %p3905_p7 = scmp.lt.s32.totalorder %s3899_s24, %s3899_s24 }
  0x15   :  { %p3906_p8 = por %p3905_p7, %p3904_p6 }
  0x17   :  { %52 = dma.hbm_to_vmem [thread:$0]  %s4761_s23, 32, %s50_s30, [#allocation5]  }
  0x18   :  { %p3907_p9 = pnand %p3906_p8, %p3900_p5 }
  0x1a   :  { %3910 = shalt.err (!%p3907_p9)
}
  0x1b   :  { %s3959_s25 = smov 128   ;;  %s3960_s3 = smov 8  }
  0x1c   :  { %s4762_s28 = sld [smem:[#allocation26_spill]]  ;;  %s3961_s29 = smov [#allocation6]  }
  0x1d   :  { %s59_s0 = sshll.u32 %s3961_s29, 4  ;;  %s3962_s20 = smov [#allocation7]   ;;  %s60_s0 = int_to_ptr.vmem [resolvable:$true] %s59_s0 }
  0x1e   :  { %s71_s1 = sshll.u32 %s3962_s20, 4  ;;  %s3919_s30 = scalar_lea.vmem %s60_s0, 16  ;;  %s72_s1 = int_to_ptr.vmem [resolvable:$true] %s71_s1 }
  0x1f   :  { %p3920_p10 = scmp.ne.s32.totalorder %s60_s0, %s3919_s30  ;;  %s3923_s22 = scalar_lea.vmem %s60_s0, 32 }
  0x20   :  { %p3924_p11 = scmp.lt.s32.totalorder %s60_s0, %s60_s0  ;;  %p3925_p12 = scmp.lt.s32.totalorder %s3923_s22, %s3919_s30 }
  0x22   :  { %38 = dma.hbm_to_vmem [thread:$0]  %s4762_s28, 4096, %s33_s21, [#allocation3], %s3959_s25, %s3959_s25, %s3960_s3  }
  0x23   :  { %p3926_p13 = por %p3925_p12, %p3924_p11 }
  0x25   :  { %p3927_p0 = pnand %p3926_p13, %p3920_p10 }
  0x27   :  { %3930 = shalt.err (!%p3927_p0)
}
  0x28   :  { %62 = dma.hbm_to_vmem [thread:$0]  %s4725_s4, 16, %s60_s0, [#allocation5]  }
  0x29   :  { %s3939_s24 = scalar_lea.vmem %s72_s1, 16  ;;  %s3943_s21 = scalar_lea.vmem %s72_s1, 32 }
  0x2a   :  { %p3940_p1 = scmp.ne.s32.totalorder %s72_s1, %s3939_s24  ;;  %p3944_p2 = scmp.lt.s32.totalorder %s72_s1, %s72_s1 }
  0x2b   :  { %p3945_p3 = scmp.lt.s32.totalorder %s3943_s21, %s3939_s24 }
  0x2d   :  { %p3946_p4 = por %p3945_p3, %p3944_p2 }
  0x2f   :  { %p3947_p5 = pnand %p3946_p4, %p3940_p1 }
  0x31   :  { %3950 = shalt.err (!%p3947_p5)
}
  0x32   :  { %74 = dma.hbm_to_vmem [thread:$0]  %s4727_s6, 16, %s72_s1, [#allocation8]  }
  0x33   :  { %3951 = dma.done.wait [#allocation3], 4096  }
  0x34   :  { %3952 = vsyncadd [#allocation3], 4294963200 }
  0x35   :  { %3953 = dma.done.wait [#allocation5], 48  }
  0x36   :  { %3954 = vsyncadd [#allocation5], 4294967248 }
  0x37   :  { %3955 = dma.done.wait [#allocation8], 16  }
  0x38   :  { %3956 = vsyncadd [#allocation8], 4294967280  ;;  %vm306_vm0 = vcmask 1041408   ;;  %vm257_vm1 = vcmask 31744   ;;  %v176_v0 = vld [vmem:[#allocation4] sm:$0x3] }
  0x39   :  { %3749 = vmatprep.subr.msk.bf16.mxu0 %vm306_vm0, %v176_v0  ;;  %v308_v1 = vsel %vm306_vm0, %v176_v0, 0  ;;  %s4763_s27 = sld [smem:[#allocation27_spill]]  ;;  %v4139_v18 = vld [vmem:[#allocation2 + $0x4] ss:$8 sps:$4 sm:$0xff]   ;;  %vm886_vm2 = vcmask 261120  }
  0x3a   :  { %3520 = vmatpush3.bf16.msra.mxu0 %v308_v1  ;;  %4764 = vst [vmem:[#allocation12_spill] sm:$0xff] %v4139_v18  ;;  %686 = vmatprep.mubr.bf16.mxu1 %v4139_v18 }
  0x3f   :  { %v3756_v2 = vld [vmem:[%s4763_s27] sm:$0xff]   ;;  %v3757_v3 = vld [vmem:[%s4763_s27 + $0x8] sm:$0xff]   ;;  %v3758_v4 = vld [vmem:[%s4763_s27 + $0x10] sm:$0xff]  }
  0x40   :  { %3521 = vmatprep.mubr.msk.bf16.mxu0 %vm257_vm1, %v3756_v2  ;;  %v3759_v5 = vld [vmem:[%s4763_s27 + $0x18] sm:$0xff]   ;;  %v3760_v6 = vld [vmem:[%s4763_s27 + $0x20] sm:$0xff]   ;;  %v3761_v7 = vld [vmem:[%s4763_s27 + $0x28] sm:$0xff]  }
  0x41   :  { %3522 = vmatmul.mubr.msk.bf16.vlgmr.msra.gmra.mxu0 %vm257_vm1, %v3757_v3  ;;  %v3762_v8 = vld [vmem:[%s4763_s27 + $0x30] sm:$0xff]   ;;  %v3763_v9 = vld [vmem:[%s4763_s27 + $0x38] sm:$0xff]   ;;  %v3764_v10 = vld [vmem:[%s4763_s27 + $0x40] sm:$0xff]  }
  0x42   :  { %3525 = vmatprep.mubr.msk.bf16.mxu0 %vm257_vm1, %v3758_v4  ;;  %v3765_v11 = vld [vmem:[%s4763_s27 + $0x48] sm:$0xff]   ;;  %v3766_v12 = vld [vmem:[%s4763_s27 + $0x50] sm:$0xff]   ;;  %v3767_v13 = vld [vmem:[%s4763_s27 + $0x58] sm:$0xff]  }
  0x43   :  { %v3768_v14 = vld [vmem:[%s4763_s27 + $0x60] sm:$0xff]   ;;  %v3769_v15 = vld [vmem:[%s4763_s27 + $0x68] sm:$0xff]   ;;  %v3770_v16 = vld [vmem:[%s4763_s27 + $0x70] sm:$0xff]  }
  0x44   :  { %v3771_v17 = vld [vmem:[%s4763_s27 + $0x78] sm:$0xff]   ;;  %v4145_v3 = vld [vmem:[#allocation2] ss:$8 sps:$4 sm:$0xff]  }
  0x45   :  { %v4147_v4 = vld [vmem:[#allocation2 + $0x14] ss:$8 sps:$4 sm:$0xff]  }
  0x49   :  { %3526 = vmatmul.mubr.msk.bf16.gmra.mxu0 %vm257_vm1, %v3759_v5  ;;  %v4151_v5 = vld [vmem:[#allocation2 + $0x10] ss:$8 sps:$4 sm:$0xff]  }
  0x4a   :  { %3529 = vmatprep.mubr.msk.bf16.mxu0 %vm257_vm1, %v3760_v6  ;;  %v4153_v6 = vld [vmem:[#allocation2 + $0x24] ss:$8 sps:$4 sm:$0xff]  }
  0x51   :  { %3530 = vmatmul.mubr.msk.bf16.gmra.mxu0 %vm257_vm1, %v3761_v7  ;;  %v4157_v7 = vld [vmem:[#allocation2 + $0x20] ss:$8 sps:$4 sm:$0xff]  }
  0x52   :  { %3533 = vmatprep.mubr.msk.bf16.mxu0 %vm257_vm1, %v3762_v8  ;;  %v4159_v8 = vld [vmem:[#allocation2 + $0x34] ss:$8 sps:$4 sm:$0xff]  }
  0x59   :  { %3534 = vmatmul.mubr.msk.bf16.gmra.mxu0 %vm257_vm1, %v3763_v9  ;;  %v4163_v9 = vld [vmem:[#allocation2 + $0x30] ss:$8 sps:$4 sm:$0xff]  }
  0x5a   :  { %3537 = vmatprep.mubr.msk.bf16.mxu0 %vm257_vm1, %v3764_v10  ;;  %v4165_v10 = vld [vmem:[#allocation2 + $0x44] ss:$8 sps:$4 sm:$0xff]  }
  0x61   :  { %3538 = vmatmul.mubr.msk.bf16.gmra.mxu0 %vm257_vm1, %v3765_v11  ;;  %v4169_v11 = vld [vmem:[#allocation2 + $0x40] ss:$8 sps:$4 sm:$0xff]  }
  0x62   :  { %3541 = vmatprep.mubr.msk.bf16.mxu0 %vm257_vm1, %v3766_v12  ;;  %v4171_v12 = vld [vmem:[#allocation2 + $0x54] ss:$8 sps:$4 sm:$0xff]  }
  0x69   :  { %3542 = vmatmul.mubr.msk.bf16.gmra.mxu0 %vm257_vm1, %v3767_v13  ;;  %v4175_v13 = vld [vmem:[#allocation2 + $0x50] ss:$8 sps:$4 sm:$0xff]  }
  0x6a   :  { %3545 = vmatprep.mubr.msk.bf16.mxu0 %vm257_vm1, %v3768_v14  ;;  %v4177_v14 = vld [vmem:[#allocation2 + $0x64] ss:$8 sps:$4 sm:$0xff]  }
  0x71   :  { %3546 = vmatmul.mubr.msk.bf16.gmra.mxu0 %vm257_vm1, %v3769_v15  ;;  %v4181_v15 = vld [vmem:[#allocation2 + $0x60] ss:$8 sps:$4 sm:$0xff]  }
  0x72   :  { %3549 = vmatprep.mubr.msk.bf16.mxu0 %vm257_vm1, %v3770_v16  ;;  %v4183_v16 = vld [vmem:[#allocation2 + $0x74] ss:$8 sps:$4 sm:$0xff]  }
  0x79   :  { %3550 = vmatmul.mubr.msk.bf16.gmra.mxu0 %vm257_vm1, %v3771_v17  ;;  %v4187_v17 = vld [vmem:[#allocation2 + $0x70] ss:$8 sps:$4 sm:$0xff]  }
 0x101   :  { %v3523_v19 = vpop.f32.mrf.mxu0 }
 0x103   :  { %v4142_v20 = vpop.f32.mrf.mxu0 }
 0x105   :  { %v3524_v21 = vpop.f32.mrf.mxu0 }
 0x106   :  { %v472_v22 = vpack.c.bf16 %v3524_v21, %v3523_v19  ;;  %v4189_v19 = vld [vmem:[#allocation2 + $0x84] ss:$8 sps:$4 sm:$0xff]   ;;  %v4195_v21 = vld [vmem:[#allocation2 + $0x94] ss:$8 sps:$4 sm:$0xff]  }
 0x107   :  { %v347_v23 = vpop.f32.mrf.mxu0 }
 0x108   :  { %v471_v2 = vpack.c.bf16 %v347_v23, %v4142_v20  ;;  %v4193_v20 = vld [vmem:[#allocation2 + $0x80] ss:$8 sps:$4 sm:$0xff]   ;;  %v4201_v23 = vld [vmem:[#allocation2 + $0xa4] ss:$8 sps:$4 sm:$0xff]  }
 0x109   :  { %v3527_v24 = vpop.f32.mrf.mxu0  ;;  %4766 = vst [vmem:[#allocation14_spill] sm:$0xff] %v4201_v23 }
 0x10b   :  { %v360_v25 = vpop.f32.mrf.mxu0 }
 0x10d   :  { %v3528_v26 = vpop.f32.mrf.mxu0 }
 0x10e   :  { %v474_v27 = vpack.c.bf16 %v3528_v26, %v3527_v24  ;;  %v4205_v24 = vld [vmem:[#allocation2 + $0xa0] ss:$8 sps:$4 sm:$0xff]  }
 0x10f   :  { %v363_v28 = vpop.f32.mrf.mxu0  ;;  %4767 = vst [vmem:[#allocation15_spill] sm:$0xff] %v4205_v24  ;;  %v3820_v26 = vld [vmem:[%s4726_s5 + $0x8] sm:$0xff]  }
 0x110   :  { %v473_v63 = vpack.c.bf16 %v363_v28, %v360_v25  ;;  %v4207_v25 = vld [vmem:[#allocation2 + $0xb4] ss:$8 sps:$4 sm:$0xff]   ;;  %3553 = vmatprep.subr.bf16.mxu0 %v3820_v26  ;;  %v4217_v28 = vld [vmem:[#allocation2 + $0xb0] ss:$8 sps:$4 sm:$0xff]  }
 0x111   :  { %v3531_v29 = vpop.f32.mrf.mxu0  ;;  %4768 = vst [vmem:[#allocation16_spill] sm:$0xff] %v4207_v25  ;;  %3554 = vmatpush3.bf16.msra.mxu0 %v3820_v26  ;;  %4769 = vst [vmem:[#allocation17_spill] sm:$0xff] %v4217_v28 }
 0x113   :  { %v376_v30 = vpop.f32.mrf.mxu0 }
 0x115   :  { %v3532_v31 = vpop.f32.mrf.mxu0 }
 0x116   :  { %v476_v58 = vpack.c.bf16 %v3532_v31, %v3531_v29  ;;  %v4219_v29 = vld [vmem:[#allocation2 + $0xc4] ss:$8 sps:$4 sm:$0xff]   ;;  %v4225_v31 = vld [vmem:[#allocation2 + $0xd4] ss:$8 sps:$4 sm:$0xff]  }
 0x117   :  { %v379_v32 = vpop.f32.mrf.mxu0  ;;  %4770 = vst [vmem:[#allocation18_spill] sm:$0xff] %v4219_v29  ;;  %4772 = vst [vmem:[#allocation20_spill] sm:$0xff] %v4225_v31 }
 0x118   :  { %v475_v60 = vpack.c.bf16 %v379_v32, %v376_v30  ;;  %v4223_v30 = vld [vmem:[#allocation2 + $0xc0] ss:$8 sps:$4 sm:$0xff]   ;;  %v4229_v32 = vld [vmem:[#allocation2 + $0xd0] ss:$8 sps:$4 sm:$0xff]  }
 0x119   :  { %v3535_v33 = vpop.f32.mrf.mxu0  ;;  %4771 = vst [vmem:[#allocation19_spill] sm:$0xff] %v4223_v30  ;;  %4773 = vst [vmem:[#allocation21_spill] sm:$0xff] %v4229_v32 }
 0x11b   :  { %v392_v34 = vpop.f32.mrf.mxu0 }
 0x11d   :  { %v3536_v35 = vpop.f32.mrf.mxu0 }
 0x11e   :  { %v478_v53 = vpack.c.bf16 %v3536_v35, %v3535_v33  ;;  %v4231_v33 = vld [vmem:[#allocation2 + $0xe4] ss:$8 sps:$4 sm:$0xff]   ;;  %v4237_v35 = vld [vmem:[#allocation2 + $0xf4] ss:$8 sps:$4 sm:$0xff]  }
 0x11f   :  { %v395_v36 = vpop.f32.mrf.mxu0  ;;  %4774 = vst [vmem:[#allocation22_spill] sm:$0xff] %v4231_v33  ;;  %4776 = vst [vmem:[#allocation24_spill] sm:$0xff] %v4237_v35 }
 0x120   :  { %v477_v56 = vpack.c.bf16 %v395_v36, %v392_v34  ;;  %v4235_v34 = vld [vmem:[#allocation2 + $0xe0] ss:$8 sps:$4 sm:$0xff]   ;;  %v4241_v36 = vld [vmem:[#allocation2 + $0xf0] ss:$8 sps:$4 sm:$0xff]  }
 0x121   :  { %v3539_v37 = vpop.f32.mrf.mxu0  ;;  %4775 = vst [vmem:[#allocation23_spill] sm:$0xff] %v4235_v34  ;;  %4777 = vst [vmem:[#allocation25_spill] sm:$0xff] %v4241_v36 }
 0x123   :  { %v408_v38 = vpop.f32.mrf.mxu0 }
 0x125   :  { %v3540_v39 = vpop.f32.mrf.mxu0 }
 0x126   :  { %v480_v0 = vpack.c.bf16 %v3540_v39, %v3539_v37 }
 0x127   :  { %v411_v40 = vpop.f32.mrf.mxu0 }
 0x128   :  { %v479_v1 = vpack.c.bf16 %v411_v40, %v408_v38  ;;  %v4244_v40 = vld [vmem:[#allocation6] ss:$0 sm:$0xff] }
 0x129   :  { %v3543_v41 = vpop.f32.mrf.mxu0 }
 0x12b   :  { %v424_v42 = vpop.f32.mrf.mxu0 }
 0x12d   :  { %v3544_v43 = vpop.f32.mrf.mxu0 }
 0x12e   :  { %v482_v61 = vpack.c.bf16 %v3544_v43, %v3543_v41 }
 0x12f   :  { %v427_v44 = vpop.f32.mrf.mxu0 }
 0x130   :  { %v481_v62 = vpack.c.bf16 %v427_v44, %v424_v42 }
 0x131   :  { %v3547_v45 = vpop.f32.mrf.mxu0 }
 0x133   :  { %v440_v46 = vpop.f32.mrf.mxu0 }
 0x135   :  { %v3548_v47 = vpop.f32.mrf.mxu0 }
 0x136   :  { %v484_v57 = vpack.c.bf16 %v3548_v47, %v3547_v45 }
 0x137   :  { %v443_v48 = vpop.f32.mrf.mxu0 }
 0x138   :  { %v483_v59 = vpack.c.bf16 %v443_v48, %v440_v46 }
 0x139   :  { %v3551_v49 = vpop.f32.mrf.mxu0 }
 0x13b   :  { %v456_v50 = vpop.f32.mrf.mxu0 }
 0x13d   :  { %v3552_v51 = vpop.f32.mrf.mxu0 }
 0x13e   :  { %v486_v52 = vpack.c.bf16 %v3552_v51, %v3551_v49 }
 0x13f   :  { %v459_v54 = vpop.f32.mrf.mxu0 }
 0x140   :  { %v485_v55 = vpack.c.bf16 %v459_v54, %v456_v50  ;;  %3057 = vmatprep.subr.bf16.mxu1 %v486_v52 }
 0x141   :  { %3058 = vmatpush3.bf16.msra.mxu1 %v478_v53 }
 0x142   :  { %3059 = vmatprep.subr.bf16.mxu1 %v485_v55 }
 0x145   :  { %3060 = vmatpush3.bf16.msra.mxu1 %v477_v56 }
 0x146   :  { %3061 = vmatprep.subr.bf16.mxu1 %v484_v57 }
 0x149   :  { %3062 = vmatpush3.bf16.msra.mxu1 %v476_v58 }
 0x14a   :  { %3063 = vmatprep.subr.bf16.mxu1 %v483_v59 }
 0x14d   :  { %3064 = vmatpush3.bf16.msra.mxu1 %v475_v60 }
 0x14e   :  { %3065 = vmatprep.subr.bf16.mxu1 %v482_v61 }
 0x151   :  { %3066 = vmatpush3.bf16.msra.mxu1 %v474_v27  ;;  %v3821_v27 = vld [vmem:[%s4726_s5] sm:$0xff]   ;;  %s4792_s5 = sld [smem:[#allocation28_spill]] }
 0x152   :  { %3067 = vmatprep.subr.bf16.mxu1 %v481_v62  ;;  %3555 = vmatprep.subr.bf16.mxu0 %v3821_v27 }
 0x153   :  { %3556 = vmatpush3.bf16.msra.mxu0 %v3821_v27 }
 0x155   :  { %3068 = vmatpush3.bf16.msra.mxu1 %v473_v63 }
 0x156   :  { %3069 = vmatprep.subr.bf16.mxu1 %v480_v0 }
 0x159   :  { %3070 = vmatpush3.bf16.msra.mxu1 %v472_v22  ;;  %v4199_v22 = vld [vmem:[#allocation2 + $0x90] ss:$8 sps:$4 sm:$0xff]  }
 0x15a   :  { %3071 = vmatprep.subr.bf16.mxu1 %v479_v1  ;;  %4765 = vst [vmem:[#allocation13_spill] sm:$0xff] %v4199_v22 }
 0x15d   :  { %3072 = vmatpush3.bf16.msra.mxu1 %v471_v2 }
 0x160   :  { %687 = vmatmul.mubr.bf16.vlgmr.msra.gmra.mxu1 %v4145_v3 }
 0x161   :  { %694 = vmatprep.mubr.bf16.mxu1 %v4147_v4 }
 0x168   :  { %695 = vmatmul.mubr.bf16.gmra.mxu1 %v4151_v5 }
 0x169   :  { %702 = vmatprep.mubr.bf16.mxu1 %v4153_v6 }
 0x170   :  { %703 = vmatmul.mubr.bf16.gmra.mxu1 %v4157_v7 }
 0x171   :  { %710 = vmatprep.mubr.bf16.mxu1 %v4159_v8 }
 0x178   :  { %711 = vmatmul.mubr.bf16.gmra.mxu1 %v4163_v9 }
 0x179   :  { %718 = vmatprep.mubr.bf16.mxu1 %v4165_v10 }
 0x180   :  { %719 = vmatmul.mubr.bf16.gmra.mxu1 %v4169_v11 }
 0x181   :  { %726 = vmatprep.mubr.bf16.mxu1 %v4171_v12 }
 0x188   :  { %727 = vmatmul.mubr.bf16.gmra.mxu1 %v4175_v13 }
 0x189   :  { %734 = vmatprep.mubr.bf16.mxu1 %v4177_v14 }
 0x190   :  { %735 = vmatmul.mubr.bf16.gmra.mxu1 %v4181_v15 }
 0x191   :  { %742 = vmatprep.mubr.bf16.mxu1 %v4183_v16 }
 0x198   :  { %743 = vmatmul.mubr.bf16.gmra.mxu1 %v4187_v17 }
 0x199   :  { %750 = vmatprep.mubr.bf16.mxu1 %v4189_v19 }
 0x1a0   :  { %751 = vmatmul.mubr.bf16.gmra.mxu1 %v4193_v20 }
 0x1a1   :  { %758 = vmatprep.mubr.bf16.mxu1 %v4195_v21 }
 0x1a8   :  { %759 = vmatmul.mubr.bf16.gmra.mxu1 %v4199_v22 }
 0x1a9   :  { %766 = vmatprep.mubr.bf16.mxu1 %v4201_v23 }
 0x1b0   :  { %767 = vmatmul.mubr.bf16.gmra.mxu1 %v4205_v24 }
 0x1b1   :  { %774 = vmatprep.mubr.bf16.mxu1 %v4207_v25 }
 0x1b8   :  { %775 = vmatmul.mubr.bf16.gmra.mxu1 %v4217_v28 }
 0x1b9   :  { %782 = vmatprep.mubr.bf16.mxu1 %v4219_v29 }
 0x1c0   :  { %783 = vmatmul.mubr.bf16.gmra.mxu1 %v4223_v30 }
 0x1c1   :  { %790 = vmatprep.mubr.bf16.mxu1 %v4225_v31 }
 0x1c8   :  { %791 = vmatmul.mubr.bf16.gmra.mxu1 %v4229_v32 }
 0x1c9   :  { %798 = vmatprep.mubr.bf16.mxu1 %v4231_v33 }
 0x1d0   :  { %799 = vmatmul.mubr.bf16.gmra.mxu1 %v4235_v34 }
 0x1d1   :  { %806 = vmatprep.mubr.bf16.mxu1 %v4237_v35 }
 0x1d8   :  { %807 = vmatmul.mubr.bf16.gmra.mxu1 %v4241_v36 }
 0x220   :  { %v3073_v37 = vpop.f32.mrf.mxu1 }
 0x222   :  { %v3074_v38 = vpop.f32.mrf.mxu1 }
 0x223   :  { %v3075_v39 = vadd.f32 %v3074_v38, %v3073_v37 }
 0x224   :  { %v3076_v41 = vpop.f32.mrf.mxu1 }
 0x225   :  { %v689_v43 = vadd.f32 %v3075_v39, %v4244_v40 }
 0x226   :  { %v3077_v42 = vpop.f32.mrf.mxu1 }
 0x227   :  { %v3078_v44 = vadd.f32 %v3077_v42, %v3076_v41  ;;  %v815_v48 = vmax.f32 %v689_v43, 0.0 }
 0x228   :  { %v3079_v45 = vpop.f32.mrf.mxu1 }
 0x229   :  { %v692_v46 = vadd.f32 %v3078_v44, %v4244_v40 }
 0x22a   :  { %v3080_v47 = vpop.f32.mrf.mxu1 }
 0x22b   :  { %v816_v49 = vmax.f32 %v692_v46, 0.0  ;;  %v3081_v50 = vadd.f32 %v3080_v47, %v3079_v45 }
 0x22c   :  { %v3082_v51 = vpop.f32.mrf.mxu1 }
 0x22d   :  { %v847_v52 = vpack.c.bf16 %v816_v49, %v815_v48  ;;  %v697_v54 = vadd.f32 %v3081_v50, %v4244_v40 }
 0x22e   :  { %v3083_v53 = vpop.f32.mrf.mxu1 }
 0x22f   :  { %v3084_v55 = vadd.f32 %v3083_v53, %v3082_v51  ;;  %3557 = vmatprep.mubr.msk.bf16.mxu0 %vm886_vm2, %v847_v52  ;;  %v817_v59 = vmax.f32 %v697_v54, 0.0 }
 0x230   :  { %v3085_v56 = vpop.f32.mrf.mxu1 }
 0x231   :  { %v700_v57 = vadd.f32 %v3084_v55, %v4244_v40 }
 0x232   :  { %v3086_v58 = vpop.f32.mrf.mxu1 }
 0x233   :  { %v818_v60 = vmax.f32 %v700_v57, 0.0  ;;  %v3087_v61 = vadd.f32 %v3086_v58, %v3085_v56 }
 0x234   :  { %v3088_v62 = vpop.f32.mrf.mxu1 }
 0x235   :  { %v848_v63 = vpack.c.bf16 %v818_v60, %v817_v59  ;;  %v705_v1 = vadd.f32 %v3087_v61, %v4244_v40 }
 0x236   :  { %v3089_v0 = vpop.f32.mrf.mxu1 }
 0x237   :  { %v3090_v2 = vadd.f32 %v3089_v0, %v3088_v62  ;;  %3558 = vmatmul.mubr.msk.bf16.vlgmr.msra.gmra.mxu0 %vm886_vm2, %v848_v63  ;;  %v819_v38 = vmax.f32 %v705_v1, 0.0 }
 0x238   :  { %v3091_v26 = vpop.f32.mrf.mxu1 }
 0x239   :  { %v708_v27 = vadd.f32 %v3090_v2, %v4244_v40 }
 0x23a   :  { %v3092_v37 = vpop.f32.mrf.mxu1 }
 0x23b   :  { %v820_v39 = vmax.f32 %v708_v27, 0.0  ;;  %v3093_v41 = vadd.f32 %v3092_v37, %v3091_v26 }
 0x23c   :  { %v3094_v42 = vpop.f32.mrf.mxu1 }
 0x23d   :  { %v849_v43 = vpack.c.bf16 %v820_v39, %v819_v38  ;;  %v713_v45 = vadd.f32 %v3093_v41, %v4244_v40 }
 0x23e   :  { %v3095_v44 = vpop.f32.mrf.mxu1 }
 0x23f   :  { %v3096_v46 = vadd.f32 %v3095_v44, %v3094_v42  ;;  %3561 = vmatprep.mubr.msk.bf16.mxu0 %vm886_vm2, %v849_v43  ;;  %v821_v50 = vmax.f32 %v713_v45, 0.0 }
 0x240   :  { %v3097_v47 = vpop.f32.mrf.mxu1 }
 0x241   :  { %v716_v48 = vadd.f32 %v3096_v46, %v4244_v40 }
 0x242   :  { %v3098_v49 = vpop.f32.mrf.mxu1 }
 0x243   :  { %v822_v51 = vmax.f32 %v716_v48, 0.0  ;;  %v3099_v52 = vadd.f32 %v3098_v49, %v3097_v47 }
 0x244   :  { %v3100_v53 = vpop.f32.mrf.mxu1 }
 0x245   :  { %v850_v54 = vpack.c.bf16 %v822_v51, %v821_v50  ;;  %v721_v56 = vadd.f32 %v3099_v52, %v4244_v40 }
 0x246   :  { %v3101_v55 = vpop.f32.mrf.mxu1 }
 0x247   :  { %v3102_v57 = vadd.f32 %v3101_v55, %v3100_v53  ;;  %3562 = vmatmul.mubr.msk.bf16.gmra.mxu0 %vm886_vm2, %v850_v54  ;;  %v823_v61 = vmax.f32 %v721_v56, 0.0 }
 0x248   :  { %v3103_v58 = vpop.f32.mrf.mxu1 }
 0x249   :  { %v724_v59 = vadd.f32 %v3102_v57, %v4244_v40 }
 0x24a   :  { %v3104_v60 = vpop.f32.mrf.mxu1 }
 0x24b   :  { %v824_v62 = vmax.f32 %v724_v59, 0.0  ;;  %v3105_v63 = vadd.f32 %v3104_v60, %v3103_v58 }
 0x24c   :  { %v3106_v0 = vpop.f32.mrf.mxu1 }
 0x24d   :  { %v851_v1 = vpack.c.bf16 %v824_v62, %v823_v61  ;;  %v729_v26 = vadd.f32 %v3105_v63, %v4244_v40 }
 0x24e   :  { %v3107_v2 = vpop.f32.mrf.mxu1 }
 0x24f   :  { %v3108_v27 = vadd.f32 %v3107_v2, %v3106_v0  ;;  %3565 = vmatprep.mubr.msk.bf16.mxu0 %vm886_vm2, %v851_v1  ;;  %v825_v41 = vmax.f32 %v729_v26, 0.0 }
 0x250   :  { %v3109_v37 = vpop.f32.mrf.mxu1 }
 0x251   :  { %v732_v38 = vadd.f32 %v3108_v27, %v4244_v40 }
 0x252   :  { %v3110_v39 = vpop.f32.mrf.mxu1 }
 0x253   :  { %v826_v42 = vmax.f32 %v732_v38, 0.0  ;;  %v3111_v43 = vadd.f32 %v3110_v39, %v3109_v37 }
 0x254   :  { %v3112_v44 = vpop.f32.mrf.mxu1 }
 0x255   :  { %v852_v45 = vpack.c.bf16 %v826_v42, %v825_v41  ;;  %v737_v47 = vadd.f32 %v3111_v43, %v4244_v40 }
 0x256   :  { %v3113_v46 = vpop.f32.mrf.mxu1 }
 0x257   :  { %v3114_v48 = vadd.f32 %v3113_v46, %v3112_v44  ;;  %3566 = vmatmul.mubr.msk.bf16.gmra.mxu0 %vm886_vm2, %v852_v45  ;;  %v827_v52 = vmax.f32 %v737_v47, 0.0 }
 0x258   :  { %v3115_v49 = vpop.f32.mrf.mxu1 }
 0x259   :  { %v740_v50 = vadd.f32 %v3114_v48, %v4244_v40 }
 0x25a   :  { %v3116_v51 = vpop.f32.mrf.mxu1 }
 0x25b   :  { %v828_v53 = vmax.f32 %v740_v50, 0.0  ;;  %v3117_v54 = vadd.f32 %v3116_v51, %v3115_v49 }
 0x25c   :  { %v3118_v55 = vpop.f32.mrf.mxu1 }
 0x25d   :  { %v853_v56 = vpack.c.bf16 %v828_v53, %v827_v52  ;;  %v745_v58 = vadd.f32 %v3117_v54, %v4244_v40 }
 0x25e   :  { %v3119_v57 = vpop.f32.mrf.mxu1 }
 0x25f   :  { %v3120_v59 = vadd.f32 %v3119_v57, %v3118_v55  ;;  %3569 = vmatprep.mubr.msk.bf16.mxu0 %vm886_vm2, %v853_v56  ;;  %v829_v63 = vmax.f32 %v745_v58, 0.0 }
 0x260   :  { %v3121_v60 = vpop.f32.mrf.mxu1 }
 0x261   :  { %v748_v61 = vadd.f32 %v3120_v59, %v4244_v40 }
 0x262   :  { %v3122_v62 = vpop.f32.mrf.mxu1 }
 0x263   :  { %v830_v0 = vmax.f32 %v748_v61, 0.0  ;;  %v3123_v1 = vadd.f32 %v3122_v62, %v3121_v60 }
 0x264   :  { %v3124_v2 = vpop.f32.mrf.mxu1 }
 0x265   :  { %v854_v26 = vpack.c.bf16 %v830_v0, %v829_v63  ;;  %v753_v37 = vadd.f32 %v3123_v1, %v4244_v40 }
 0x266   :  { %v3125_v27 = vpop.f32.mrf.mxu1 }
 0x267   :  { %v3126_v38 = vadd.f32 %v3125_v27, %v3124_v2  ;;  %3570 = vmatmul.mubr.msk.bf16.gmra.mxu0 %vm886_vm2, %v854_v26  ;;  %v831_v43 = vmax.f32 %v753_v37, 0.0 }
 0x268   :  { %v3127_v39 = vpop.f32.mrf.mxu1 }
 0x269   :  { %v756_v41 = vadd.f32 %v3126_v38, %v4244_v40 }
 0x26a   :  { %v3128_v42 = vpop.f32.mrf.mxu1 }
 0x26b   :  { %v832_v44 = vmax.f32 %v756_v41, 0.0  ;;  %v3129_v45 = vadd.f32 %v3128_v42, %v3127_v39 }
 0x26c   :  { %v3130_v46 = vpop.f32.mrf.mxu1 }
 0x26d   :  { %v855_v47 = vpack.c.bf16 %v832_v44, %v831_v43  ;;  %v761_v49 = vadd.f32 %v3129_v45, %v4244_v40 }
 0x26e   :  { %v3131_v48 = vpop.f32.mrf.mxu1 }
 0x26f   :  { %v3132_v50 = vadd.f32 %v3131_v48, %v3130_v46  ;;  %3573 = vmatprep.mubr.msk.bf16.mxu0 %vm886_vm2, %v855_v47  ;;  %v833_v54 = vmax.f32 %v761_v49, 0.0 }
 0x270   :  { %v3133_v51 = vpop.f32.mrf.mxu1 }
 0x271   :  { %v764_v52 = vadd.f32 %v3132_v50, %v4244_v40 }
 0x272   :  { %v3134_v53 = vpop.f32.mrf.mxu1 }
 0x273   :  { %v834_v55 = vmax.f32 %v764_v52, 0.0  ;;  %v3135_v56 = vadd.f32 %v3134_v53, %v3133_v51 }
 0x274   :  { %v3136_v57 = vpop.f32.mrf.mxu1 }
 0x275   :  { %v856_v58 = vpack.c.bf16 %v834_v55, %v833_v54  ;;  %v769_v60 = vadd.f32 %v3135_v56, %v4244_v40 }
 0x276   :  { %v3137_v59 = vpop.f32.mrf.mxu1 }
 0x277   :  { %v3138_v61 = vadd.f32 %v3137_v59, %v3136_v57  ;;  %3574 = vmatmul.mubr.msk.bf16.gmra.mxu0 %vm886_vm2, %v856_v58  ;;  %v835_v1 = vmax.f32 %v769_v60, 0.0 }
 0x278   :  { %v3139_v62 = vpop.f32.mrf.mxu1 }
 0x279   :  { %v772_v63 = vadd.f32 %v3138_v61, %v4244_v40 }
 0x27a   :  { %v3140_v0 = vpop.f32.mrf.mxu1 }
 0x27b   :  { %v836_v2 = vmax.f32 %v772_v63, 0.0  ;;  %v3141_v26 = vadd.f32 %v3140_v0, %v3139_v62 }
 0x27c   :  { %v3142_v27 = vpop.f32.mrf.mxu1 }
 0x27d   :  { %v857_v37 = vpack.c.bf16 %v836_v2, %v835_v1  ;;  %v777_v39 = vadd.f32 %v3141_v26, %v4244_v40 }
 0x27e   :  { %v3143_v38 = vpop.f32.mrf.mxu1 }
 0x27f   :  { %v3144_v41 = vadd.f32 %v3143_v38, %v3142_v27  ;;  %3577 = vmatprep.mubr.msk.bf16.mxu0 %vm886_vm2, %v857_v37  ;;  %v837_v45 = vmax.f32 %v777_v39, 0.0 }
 0x280   :  { %v3145_v42 = vpop.f32.mrf.mxu1 }
 0x281   :  { %v780_v43 = vadd.f32 %v3144_v41, %v4244_v40 }
 0x282   :  { %v3146_v44 = vpop.f32.mrf.mxu1 }
 0x283   :  { %v838_v46 = vmax.f32 %v780_v43, 0.0  ;;  %v3147_v47 = vadd.f32 %v3146_v44, %v3145_v42 }
 0x284   :  { %v3148_v48 = vpop.f32.mrf.mxu1 }
 0x285   :  { %v858_v49 = vpack.c.bf16 %v838_v46, %v837_v45  ;;  %v785_v51 = vadd.f32 %v3147_v47, %v4244_v40 }
 0x286   :  { %v3149_v50 = vpop.f32.mrf.mxu1 }
 0x287   :  { %v3150_v52 = vadd.f32 %v3149_v50, %v3148_v48  ;;  %3578 = vmatmul.mubr.msk.bf16.gmra.mxu0 %vm886_vm2, %v858_v49  ;;  %v839_v56 = vmax.f32 %v785_v51, 0.0 }
 0x288   :  { %v3151_v53 = vpop.f32.mrf.mxu1 }
 0x289   :  { %v788_v54 = vadd.f32 %v3150_v52, %v4244_v40 }
 0x28a   :  { %v3152_v55 = vpop.f32.mrf.mxu1 }
 0x28b   :  { %v840_v57 = vmax.f32 %v788_v54, 0.0  ;;  %v3153_v58 = vadd.f32 %v3152_v55, %v3151_v53 }
 0x28c   :  { %v3154_v59 = vpop.f32.mrf.mxu1 }
 0x28d   :  { %v859_v60 = vpack.c.bf16 %v840_v57, %v839_v56  ;;  %v793_v62 = vadd.f32 %v3153_v58, %v4244_v40 }
 0x28e   :  { %v3155_v61 = vpop.f32.mrf.mxu1 }
 0x28f   :  { %v3156_v63 = vadd.f32 %v3155_v61, %v3154_v59  ;;  %3581 = vmatprep.mubr.msk.bf16.mxu0 %vm886_vm2, %v859_v60  ;;  %v841_v26 = vmax.f32 %v793_v62, 0.0  ;;  %v4295_v60 = vld [vmem:[#allocation7] ss:$0 sm:$0xff] }
 0x290   :  { %v3157_v0 = vpop.f32.mrf.mxu1 }
 0x291   :  { %v796_v1 = vadd.f32 %v3156_v63, %v4244_v40 }
 0x292   :  { %v3158_v2 = vpop.f32.mrf.mxu1 }
 0x293   :  { %v842_v27 = vmax.f32 %v796_v1, 0.0  ;;  %v3159_v37 = vadd.f32 %v3158_v2, %v3157_v0 }
 0x294   :  { %v3160_v38 = vpop.f32.mrf.mxu1 }
 0x295   :  { %v860_v39 = vpack.c.bf16 %v842_v27, %v841_v26  ;;  %v801_v42 = vadd.f32 %v3159_v37, %v4244_v40 }
 0x296   :  { %v3161_v41 = vpop.f32.mrf.mxu1 }
 0x297   :  { %v3162_v43 = vadd.f32 %v3161_v41, %v3160_v38  ;;  %3582 = vmatmul.mubr.msk.bf16.gmra.mxu0 %vm886_vm2, %v860_v39  ;;  %v843_v47 = vmax.f32 %v801_v42, 0.0 }
 0x298   :  { %v3163_v44 = vpop.f32.mrf.mxu1 }
 0x299   :  { %v804_v45 = vadd.f32 %v3162_v43, %v4244_v40 }
 0x29a   :  { %v3164_v46 = vpop.f32.mrf.mxu1 }
 0x29b   :  { %v844_v48 = vmax.f32 %v804_v45, 0.0  ;;  %v3165_v49 = vadd.f32 %v3164_v46, %v3163_v44 }
 0x29c   :  { %v3166_v50 = vpop.f32.mrf.mxu1 }
 0x29d   :  { %v861_v51 = vpack.c.bf16 %v844_v48, %v843_v47  ;;  %v809_v53 = vadd.f32 %v3165_v49, %v4244_v40 }
 0x29e   :  { %v3167_v52 = vpop.f32.mrf.mxu1 }
 0x29f   :  { %v3168_v54 = vadd.f32 %v3167_v52, %v3166_v50  ;;  %3585 = vmatprep.mubr.msk.bf16.mxu0 %vm886_vm2, %v861_v51  ;;  %v845_v56 = vmax.f32 %v809_v53, 0.0 }
 0x2a1   :  { %v812_v55 = vadd.f32 %v3168_v54, %v4244_v40 }
 0x2a3   :  { %v846_v57 = vmax.f32 %v812_v55, 0.0 }
 0x2a5   :  { %v862_v58 = vpack.c.bf16 %v846_v57, %v845_v56 }
 0x2a7   :  { %3586 = vmatmul.mubr.msk.bf16.gmra.mxu0 %vm886_vm2, %v862_v58 }
 0x2a8   :  { %1176 = vmatprep.mubr.bf16.mxu0 %v4139_v18 }
 0x2f7   :  { %v3559_v59 = vpop.f32.mrf.mxu0 }
 0x2f8   :  { %v978_v62 = vadd.f32 %v3559_v59, %v4295_v60 }
 0x2f9   :  { %v4297_v61 = vpop.f32.mrf.mxu0 }
 0x2fa   :  { %v1098_v1 = vmax.f32 %v978_v62, 0.0 }
 0x2fb   :  { %v3560_v63 = vpop.f32.mrf.mxu0 }
 0x2fc   :  { %v981_v0 = vadd.f32 %v3560_v63, %v4295_v60 }
 0x2fd   :  { %v4303_v26 = vpop.f32.mrf.mxu0 }
 0x2fe   :  { %v1099_v2 = vmax.f32 %v981_v0, 0.0 }
 0x300   :  { %v4301_v40 = vpack.c.bf16 %v1099_v2, %v1098_v1 }
 0x307   :  { %v3563_v27 = vpop.f32.mrf.mxu0 }
 0x308   :  { %v994_v38 = vadd.f32 %v3563_v27, %v4295_v60 }
 0x309   :  { %v4305_v37 = vpop.f32.mrf.mxu0 }
 0x30a   :  { %v1102_v42 = vmax.f32 %v994_v38, 0.0 }
 0x30b   :  { %v3564_v39 = vpop.f32.mrf.mxu0 }
 0x30c   :  { %v997_v41 = vadd.f32 %v3564_v39, %v4295_v60 }
 0x30d   :  { %v4311_v45 = vpop.f32.mrf.mxu0 }
 0x30e   :  { %v1103_v43 = vmax.f32 %v997_v41, 0.0 }
 0x310   :  { %v4309_v44 = vpack.c.bf16 %v1103_v43, %v1102_v42 }
 0x317   :  { %v3567_v46 = vpop.f32.mrf.mxu0 }
 0x319   :  { %v1001_v47 = vpop.f32.mrf.mxu0 }
 0x31b   :  { %v3568_v48 = vpop.f32.mrf.mxu0 }
 0x31d   :  { %v1004_v49 = vpop.f32.mrf.mxu0 }
 0x327   :  { %v3571_v50 = vpop.f32.mrf.mxu0 }
 0x328   :  { %v1026_v43 = vadd.f32 %v3571_v50, %v4295_v60 }
 0x329   :  { %v1017_v51 = vpop.f32.mrf.mxu0 }
 0x32a   :  { %v1110_v28 = vmax.f32 %v1026_v43, 0.0 }
 0x32b   :  { %v3572_v52 = vpop.f32.mrf.mxu0 }
 0x32c   :  { %v1029_v39 = vadd.f32 %v3572_v52, %v4295_v60 }
 0x32d   :  { %v1020_v53 = vpop.f32.mrf.mxu0 }
 0x32e   :  { %v1111_v34 = vmax.f32 %v1029_v39, 0.0  ;;  %v1021_v33 = vadd.f32 %v4295_v60, %v1020_v53 }
 0x330   :  { %v1135_v39 = vpack.c.bf16 %v1111_v34, %v1110_v28  ;;  %v1109_v23 = vmax.f32 %v1021_v33, 0.0 }
 0x337   :  { %v4313_v54 = vpop.f32.mrf.mxu0 }
 0x339   :  { %v4315_v55 = vpop.f32.mrf.mxu0 }
 0x33b   :  { %v4317_v56 = vpop.f32.mrf.mxu0 }
 0x33d   :  { %v4319_v57 = vpop.f32.mrf.mxu0 }
 0x347   :  { %v3579_v58 = vpop.f32.mrf.mxu0 }
 0x349   :  { %v1049_v59 = vpop.f32.mrf.mxu0 }
 0x34b   :  { %v3580_v62 = vpop.f32.mrf.mxu0 }
 0x34c   :  { %v1061_v28 = vadd.f32 %v3580_v62, %v4295_v60  ;;  %v1050_v62 = vadd.f32 %v4295_v60, %v1049_v59 }
 0x34d   :  { %v1052_v63 = vpop.f32.mrf.mxu0 }
 0x357   :  { %v3583_v0 = vpop.f32.mrf.mxu0 }
 0x358   :  { %v1074_v50 = vadd.f32 %v3583_v0, %v4295_v60 }
 0x359   :  { %v1065_v1 = vpop.f32.mrf.mxu0 }
 0x35b   :  { %v3584_v2 = vpop.f32.mrf.mxu0 }
 0x35c   :  { %v1077_v31 = vadd.f32 %v3584_v2, %v4295_v60 }
 0x35d   :  { %v1068_v27 = vpop.f32.mrf.mxu0 }
 0x35e   :  { %v1123_v53 = vmax.f32 %v1077_v31, 0.0  ;;  %v1069_v22 = vadd.f32 %v4295_v60, %v1068_v27  ;;  %v1053_v27 = vadd.f32 %v4295_v60, %v1052_v63  ;;  %v1042_v63 = vadd.f32 %v4313_v54, %v4295_v60 }
 0x360   :  { %v1121_v31 = vmax.f32 %v1069_v22, 0.0  ;;  %v989_v22 = vadd.f32 %v4295_v60, %v4311_v45  ;;  %v1037_v45 = vadd.f32 %v4295_v60, %v4319_v57 }
 0x362   :  { %v1101_v59 = vmax.f32 %v989_v22, 0.0 }
 0x367   :  { %v3587_v38 = vpop.f32.mrf.mxu0 }
 0x368   :  { %v1090_v42 = vadd.f32 %v3587_v38, %v4295_v60  ;;  %v1018_v38 = vadd.f32 %v4295_v60, %v1017_v51  ;;  %v1066_v51 = vadd.f32 %v4295_v60, %v1065_v1  ;;  %v1119_v1 = vmax.f32 %v1061_v28, 0.0 }
 0x369   :  { %v1081_v41 = vpop.f32.mrf.mxu0 }
 0x36a   :  { %v1082_v36 = vadd.f32 %v4295_v60, %v1081_v41  ;;  %v1126_v30 = vmax.f32 %v1090_v42, 0.0  ;;  %v1122_v42 = vmax.f32 %v1074_v50, 0.0  ;;  %v986_v50 = vadd.f32 %v4295_v60, %v4305_v37 }
 0x36b   :  { %v3588_v18 = vpop.f32.mrf.mxu0  ;;  %v973_v37 = vadd.f32 %v4295_v60, %v4303_v26 }
 0x36c   :  { %v1093_v35 = vadd.f32 %v3588_v18, %v4295_v60  ;;  %v1124_v25 = vmax.f32 %v1082_v36, 0.0  ;;  %v1013_v18 = vadd.f32 %v3568_v48, %v4295_v60  ;;  %v1141_v33 = vpack.c.bf16 %v1123_v53, %v1122_v42 }
 0x36d   :  { %v1084_v32 = vpop.f32.mrf.mxu0  ;;  %v1100_v53 = vmax.f32 %v986_v50, 0.0  ;;  %v970_v42 = vadd.f32 %v4295_v60, %v4297_v61 }
 0x36e   :  { %v1127_v29 = vmax.f32 %v1093_v35, 0.0  ;;  %v1085_v52 = vadd.f32 %v4295_v60, %v1084_v32  ;;  %v1010_v35 = vadd.f32 %v3567_v46, %v4295_v60  ;;  %v1108_v32 = vmax.f32 %v1018_v38, 0.0 }
 0x36f   :  { %v1107_v36 = vmax.f32 %v1013_v18, 0.0  ;;  %v1120_v46 = vmax.f32 %v1066_v51, 0.0  ;;  %v1117_v38 = vmax.f32 %v1053_v27, 0.0  ;;  %v1130_v54 = vpack.c.bf16 %v1101_v59, %v1100_v53 }
 0x370   :  { %v1143_v24 = vpack.c.bf16 %v1127_v29, %v1126_v30  ;;  %v1125_v41 = vmax.f32 %v1085_v52, 0.0  ;;  %v1005_v29 = vadd.f32 %v4295_v60, %v1004_v49  ;;  %v1134_v30 = vpack.c.bf16 %v1109_v23, %v1108_v32 }
 0x371   :  { %v1106_v34 = vmax.f32 %v1010_v35, 0.0  ;;  %v1140_v43 = vpack.c.bf16 %v1121_v31, %v1120_v46  ;;  %v1113_v32 = vmax.f32 %v1037_v45, 0.0  ;;  %v1097_v51 = vmax.f32 %v973_v37, 0.0 }
 0x372   :  { %3187 = vmatprep.subr.bf16.mxu0 %v1143_v24  ;;  %v1142_v2 = vpack.c.bf16 %v1125_v41, %v1124_v25  ;;  %v1002_v24 = vadd.f32 %v4295_v60, %v1001_v47  ;;  %v1058_v25 = vadd.f32 %v3579_v58, %v4295_v60  ;;  %v1105_v0 = vmax.f32 %v1005_v29, 0.0 }
 0x373   :  { %3188 = vmatpush3.bf16.msra.mxu0 %v1135_v39  ;;  %v1133_v48 = vpack.c.bf16 %v1107_v36, %v1106_v34  ;;  %v1045_v58 = vadd.f32 %v4317_v56, %v4295_v60  ;;  %v1116_v41 = vmax.f32 %v1050_v62, 0.0  ;;  %v1114_v56 = vmax.f32 %v1042_v63, 0.0 }
 0x374   :  { %3189 = vmatprep.subr.bf16.mxu0 %v1142_v2  ;;  %v1104_v49 = vmax.f32 %v1002_v24, 0.0  ;;  %v1118_v23 = vmax.f32 %v1058_v25, 0.0  ;;  %v1034_v2 = vadd.f32 %v4295_v60, %v4315_v55 }
 0x375   :  { %v1115_v18 = vmax.f32 %v1045_v58, 0.0  ;;  %v1138_v39 = vpack.c.bf16 %v1117_v38, %v1116_v41 }
 0x376   :  { %v1132_v47 = vpack.c.bf16 %v1105_v0, %v1104_v49  ;;  %v1139_v52 = vpack.c.bf16 %v1119_v1, %v1118_v23  ;;  %v1112_v57 = vmax.f32 %v1034_v2, 0.0 }
 0x377   :  { %3190 = vmatpush3.bf16.msra.mxu0 %v1134_v30  ;;  %v1137_v35 = vpack.c.bf16 %v1115_v18, %v1114_v56 }
 0x378   :  { %3191 = vmatprep.subr.bf16.mxu0 %v1141_v33  ;;  %v1136_v36 = vpack.c.bf16 %v1113_v32, %v1112_v57 }
 0x37b   :  { %3192 = vmatpush3.bf16.msra.mxu0 %v1133_v48 }
 0x37c   :  { %3193 = vmatprep.subr.bf16.mxu0 %v1140_v43 }
 0x37f   :  { %3194 = vmatpush3.bf16.msra.mxu0 %v1132_v47 }
 0x380   :  { %3195 = vmatprep.subr.bf16.mxu0 %v1139_v52 }
 0x383   :  { %3196 = vmatpush3.bf16.msra.mxu0 %v4309_v44  ;;  %v1096_v44 = vmax.f32 %v970_v42, 0.0 }
 0x384   :  { %3197 = vmatprep.subr.bf16.mxu0 %v1138_v39 }
 0x385   :  { %v1128_v55 = vpack.c.bf16 %v1097_v51, %v1096_v44 }
 0x387   :  { %3198 = vmatpush3.bf16.msra.mxu0 %v1130_v54 }
 0x388   :  { %3199 = vmatprep.subr.bf16.mxu0 %v1137_v35 }
 0x38b   :  { %3200 = vmatpush3.bf16.msra.mxu0 %v4301_v40 }
 0x38c   :  { %3201 = vmatprep.subr.bf16.mxu0 %v1136_v36 }
 0x38f   :  { %3202 = vmatpush3.bf16.msra.mxu0 %v1128_v55 }
 0x392   :  { %1177 = vmatmul.mubr.bf16.vlgmr.msra.gmra.mxu0 %v4145_v3  ;;  %v4778_v3 = vld [vmem:[#allocation13_spill] sm:$0xff] }
 0x393   :  { %1184 = vmatprep.mubr.bf16.mxu0 %v4147_v4  ;;  %v4779_v4 = vld [vmem:[#allocation14_spill] sm:$0xff] }
 0x39a   :  { %1185 = vmatmul.mubr.bf16.gmra.mxu0 %v4151_v5  ;;  %v3822_v5 = vld [vmem:[%s4728_s7 + $0x8] sm:$0xff]  }
 0x39b   :  { %1192 = vmatprep.mubr.bf16.mxu0 %v4153_v6  ;;  %3589 = vmatprep.subr.bf16.mxu1 %v3822_v5  ;;  %v3823_v6 = vld [vmem:[%s4728_s7] sm:$0xff]  }
 0x39c   :  { %3590 = vmatpush3.bf16.msra.mxu1 %v3822_v5 }
 0x39d   :  { %3591 = vmatprep.subr.bf16.mxu1 %v3823_v6 }
 0x3a0   :  { %3592 = vmatpush3.bf16.msra.mxu1 %v3823_v6 }
 0x3a2   :  { %1193 = vmatmul.mubr.bf16.gmra.mxu0 %v4157_v7  ;;  %v4780_v7 = vld [vmem:[#allocation15_spill] sm:$0xff] }
 0x3a3   :  { %1200 = vmatprep.mubr.bf16.mxu0 %v4159_v8  ;;  %v4781_v8 = vld [vmem:[#allocation16_spill] sm:$0xff] }
 0x3aa   :  { %1201 = vmatmul.mubr.bf16.gmra.mxu0 %v4163_v9  ;;  %v4782_v9 = vld [vmem:[#allocation17_spill] sm:$0xff] }
 0x3ab   :  { %1208 = vmatprep.mubr.bf16.mxu0 %v4165_v10  ;;  %v4783_v10 = vld [vmem:[#allocation18_spill] sm:$0xff] }
 0x3b2   :  { %1209 = vmatmul.mubr.bf16.gmra.mxu0 %v4169_v11  ;;  %v4784_v11 = vld [vmem:[#allocation19_spill] sm:$0xff] }
 0x3b3   :  { %1216 = vmatprep.mubr.bf16.mxu0 %v4171_v12  ;;  %v4785_v12 = vld [vmem:[#allocation20_spill] sm:$0xff] }
 0x3ba   :  { %1217 = vmatmul.mubr.bf16.gmra.mxu0 %v4175_v13  ;;  %v4786_v13 = vld [vmem:[#allocation21_spill] sm:$0xff] }
 0x3bb   :  { %1224 = vmatprep.mubr.bf16.mxu0 %v4177_v14  ;;  %v4787_v14 = vld [vmem:[#allocation22_spill] sm:$0xff] }
 0x3c2   :  { %1225 = vmatmul.mubr.bf16.gmra.mxu0 %v4181_v15  ;;  %v4788_v15 = vld [vmem:[#allocation23_spill] sm:$0xff] }
 0x3c3   :  { %1232 = vmatprep.mubr.bf16.mxu0 %v4183_v16  ;;  %v4789_v16 = vld [vmem:[#allocation24_spill] sm:$0xff] }
 0x3ca   :  { %1233 = vmatmul.mubr.bf16.gmra.mxu0 %v4187_v17  ;;  %v4790_v17 = vld [vmem:[#allocation25_spill] sm:$0xff] }
 0x3cb   :  { %1240 = vmatprep.mubr.bf16.mxu0 %v4189_v19  ;;  %v4791_v19 = vld [vmem:[#allocation12_spill] sm:$0xff] }
 0x3d2   :  { %1241 = vmatmul.mubr.bf16.gmra.mxu0 %v4193_v20 }
 0x3d3   :  { %1248 = vmatprep.mubr.bf16.mxu0 %v4195_v21 }
 0x3da   :  { %1249 = vmatmul.mubr.bf16.gmra.mxu0 %v4778_v3 }
 0x3db   :  { %1256 = vmatprep.mubr.bf16.mxu0 %v4779_v4 }
 0x3e2   :  { %1257 = vmatmul.mubr.bf16.gmra.mxu0 %v4780_v7 }
 0x3e3   :  { %1264 = vmatprep.mubr.bf16.mxu0 %v4781_v8 }
 0x3ea   :  { %1265 = vmatmul.mubr.bf16.gmra.mxu0 %v4782_v9 }
 0x3eb   :  { %1272 = vmatprep.mubr.bf16.mxu0 %v4783_v10 }
 0x3f2   :  { %1273 = vmatmul.mubr.bf16.gmra.mxu0 %v4784_v11 }
 0x3f3   :  { %1280 = vmatprep.mubr.bf16.mxu0 %v4785_v12 }
 0x3fa   :  { %1281 = vmatmul.mubr.bf16.gmra.mxu0 %v4786_v13 }
 0x3fb   :  { %1288 = vmatprep.mubr.bf16.mxu0 %v4787_v14 }
 0x402   :  { %1289 = vmatmul.mubr.bf16.gmra.mxu0 %v4788_v15 }
 0x403   :  { %1296 = vmatprep.mubr.bf16.mxu0 %v4789_v16 }
 0x40a   :  { %1297 = vmatmul.mubr.bf16.gmra.mxu0 %v4790_v17 }
 0x40b   :  { %1913 = vmatprep.mubr.bf16.mxu0 %v4791_v19 }
 0x452   :  { %v3203_v20 = vpop.f32.mrf.mxu0 }
 0x454   :  { %v3204_v21 = vpop.f32.mrf.mxu0 }
 0x455   :  { %v3205_v40 = vadd.f32 %v3204_v21, %v3203_v20 }
 0x456   :  { %v3206_v60 = vpop.f32.mrf.mxu0 }
 0x458   :  { %v3207_v61 = vpop.f32.mrf.mxu0 }
 0x459   :  { %v3208_v26 = vadd.f32 %v3207_v61, %v3206_v60 }
 0x45a   :  { %v3209_v29 = vpop.f32.mrf.mxu0 }
 0x45b   :  { %v1305_v30 = vpack.c.bf16 %v3208_v26, %v3205_v40 }
 0x45c   :  { %v3210_v28 = vpop.f32.mrf.mxu0 }
 0x45d   :  { %3593 = vmatprep.mubr.msk.bf16.mxu1 %vm886_vm2, %v1305_v30  ;;  %v3211_v34 = vadd.f32 %v3210_v28, %v3209_v29 }
 0x45e   :  { %v3212_v33 = vpop.f32.mrf.mxu0 }
 0x460   :  { %v3213_v31 = vpop.f32.mrf.mxu0 }
 0x461   :  { %v3214_v24 = vadd.f32 %v3213_v31, %v3212_v33 }
 0x462   :  { %v3215_v25 = vpop.f32.mrf.mxu0 }
 0x463   :  { %v1306_v46 = vpack.c.bf16 %v3214_v24, %v3211_v34  ;;  %v3824_v24 = vld [vmem:[%s4730_s9 + $0x8] sm:$0xff]  }
 0x464   :  { %v3216_v48 = vpop.f32.mrf.mxu0  ;;  %3625 = vmatprep.subr.bf16.mxu1 %v3824_v24 }
 0x465   :  { %3594 = vmatmul.mubr.msk.bf16.vlgmr.msra.gmra.mxu1 %vm886_vm2, %v1306_v46  ;;  %v3217_v27 = vadd.f32 %v3216_v48, %v3215_v25 }
 0x466   :  { %v3218_v0 = vpop.f32.mrf.mxu0  ;;  %3626 = vmatpush3.bf16.msra.mxu1 %v3824_v24 }
 0x468   :  { %v3219_v1 = vpop.f32.mrf.mxu0 }
 0x469   :  { %v3220_v43 = vadd.f32 %v3219_v1, %v3218_v0  ;;  %v3825_v0 = vld [vmem:[%s4730_s9] sm:$0xff]  }
 0x46a   :  { %v3221_v49 = vpop.f32.mrf.mxu0  ;;  %3627 = vmatprep.subr.bf16.mxu1 %v3825_v0 }
 0x46b   :  { %v1307_v23 = vpack.c.bf16 %v3220_v43, %v3217_v27  ;;  %3628 = vmatpush3.bf16.msra.mxu1 %v3825_v0 }
 0x46c   :  { %v3222_v62 = vpop.f32.mrf.mxu0 }
 0x46d   :  { %3597 = vmatprep.mubr.msk.bf16.mxu1 %vm886_vm2, %v1307_v23  ;;  %v3223_v58 = vadd.f32 %v3222_v62, %v3221_v49 }
 0x46e   :  { %v3224_v22 = vpop.f32.mrf.mxu0 }
 0x470   :  { %v3225_v47 = vpop.f32.mrf.mxu0 }
 0x471   :  { %v3226_v52 = vadd.f32 %v3225_v47, %v3224_v22 }
 0x472   :  { %v3227_v38 = vpop.f32.mrf.mxu0 }
 0x473   :  { %v1308_v50 = vpack.c.bf16 %v3226_v52, %v3223_v58 }
 0x474   :  { %v3228_v63 = vpop.f32.mrf.mxu0 }
 0x475   :  { %3598 = vmatmul.mubr.msk.bf16.gmra.mxu1 %vm886_vm2, %v1308_v50  ;;  %v3229_v18 = vadd.f32 %v3228_v63, %v3227_v38 }
 0x476   :  { %v3230_v41 = vpop.f32.mrf.mxu0 }
 0x478   :  { %v3231_v59 = vpop.f32.mrf.mxu0 }
 0x479   :  { %v3232_v45 = vadd.f32 %v3231_v59, %v3230_v41 }
 0x47a   :  { %v3233_v39 = vpop.f32.mrf.mxu0 }
 0x47b   :  { %v1309_v53 = vpack.c.bf16 %v3232_v45, %v3229_v18 }
 0x47c   :  { %v3234_v56 = vpop.f32.mrf.mxu0 }
 0x47d   :  { %3601 = vmatprep.mubr.msk.bf16.mxu1 %vm886_vm2, %v1309_v53  ;;  %v3235_v54 = vadd.f32 %v3234_v56, %v3233_v39 }
 0x47e   :  { %v3236_v2 = vpop.f32.mrf.mxu0 }
 0x480   :  { %v3237_v37 = vpop.f32.mrf.mxu0 }
 0x481   :  { %v3238_v35 = vadd.f32 %v3237_v37, %v3236_v2 }
 0x482   :  { %v3239_v32 = vpop.f32.mrf.mxu0 }
 0x483   :  { %v1310_v42 = vpack.c.bf16 %v3238_v35, %v3235_v54 }
 0x484   :  { %v3240_v57 = vpop.f32.mrf.mxu0 }
 0x485   :  { %3602 = vmatmul.mubr.msk.bf16.gmra.mxu1 %vm886_vm2, %v1310_v42  ;;  %v3241_v44 = vadd.f32 %v3240_v57, %v3239_v32 }
 0x486   :  { %v3242_v51 = vpop.f32.mrf.mxu0 }
 0x488   :  { %v3243_v36 = vpop.f32.mrf.mxu0 }
 0x489   :  { %v3244_v55 = vadd.f32 %v3243_v36, %v3242_v51 }
 0x48a   :  { %v3245_v3 = vpop.f32.mrf.mxu0 }
 0x48b   :  { %v1311_v4 = vpack.c.bf16 %v3244_v55, %v3241_v44 }
 0x48c   :  { %v3246_v5 = vpop.f32.mrf.mxu0 }
 0x48d   :  { %3605 = vmatprep.mubr.msk.bf16.mxu1 %vm886_vm2, %v1311_v4  ;;  %v3247_v8 = vadd.f32 %v3246_v5, %v3245_v3 }
 0x48e   :  { %v3248_v6 = vpop.f32.mrf.mxu0 }
 0x490   :  { %v3249_v7 = vpop.f32.mrf.mxu0 }
 0x491   :  { %v3250_v9 = vadd.f32 %v3249_v7, %v3248_v6  ;;  %v4422_v7 = vld [vmem:[%s4729_s8] ss:$0 sm:$0xff] }
 0x492   :  { %v3251_v10 = vpop.f32.mrf.mxu0 }
 0x493   :  { %v1312_v11 = vpack.c.bf16 %v3250_v9, %v3247_v8 }
 0x494   :  { %v3252_v12 = vpop.f32.mrf.mxu0 }
 0x495   :  { %3606 = vmatmul.mubr.msk.bf16.gmra.mxu1 %vm886_vm2, %v1312_v11  ;;  %v3253_v15 = vadd.f32 %v3252_v12, %v3251_v10 }
 0x496   :  { %v3254_v13 = vpop.f32.mrf.mxu0 }
 0x498   :  { %v3255_v14 = vpop.f32.mrf.mxu0 }
 0x499   :  { %v3256_v16 = vadd.f32 %v3255_v14, %v3254_v13 }
 0x49a   :  { %v3257_v17 = vpop.f32.mrf.mxu0 }
 0x49b   :  { %v1313_v19 = vpack.c.bf16 %v3256_v16, %v3253_v15 }
 0x49c   :  { %v3258_v20 = vpop.f32.mrf.mxu0 }
 0x49d   :  { %3609 = vmatprep.mubr.msk.bf16.mxu1 %vm886_vm2, %v1313_v19  ;;  %v3259_v61 = vadd.f32 %v3258_v20, %v3257_v17 }
 0x49e   :  { %v3260_v21 = vpop.f32.mrf.mxu0 }
 0x4a0   :  { %v3261_v60 = vpop.f32.mrf.mxu0 }
 0x4a1   :  { %v3262_v40 = vadd.f32 %v3261_v60, %v3260_v21 }
 0x4a2   :  { %v3263_v26 = vpop.f32.mrf.mxu0 }
 0x4a3   :  { %v1314_v29 = vpack.c.bf16 %v3262_v40, %v3259_v61 }
 0x4a4   :  { %v3264_v30 = vpop.f32.mrf.mxu0 }
 0x4a5   :  { %3610 = vmatmul.mubr.msk.bf16.gmra.mxu1 %vm886_vm2, %v1314_v29  ;;  %v3265_v31 = vadd.f32 %v3264_v30, %v3263_v26 }
 0x4a6   :  { %v3266_v28 = vpop.f32.mrf.mxu0 }
 0x4a8   :  { %v3267_v33 = vpop.f32.mrf.mxu0 }
 0x4a9   :  { %v3268_v34 = vadd.f32 %v3267_v33, %v3266_v28 }
 0x4aa   :  { %v3269_v25 = vpop.f32.mrf.mxu0 }
 0x4ab   :  { %v1315_v46 = vpack.c.bf16 %v3268_v34, %v3265_v31 }
 0x4ac   :  { %v3270_v48 = vpop.f32.mrf.mxu0 }
 0x4ad   :  { %3613 = vmatprep.mubr.msk.bf16.mxu1 %vm886_vm2, %v1315_v46  ;;  %v3271_v43 = vadd.f32 %v3270_v48, %v3269_v25 }
 0x4ae   :  { %v3272_v1 = vpop.f32.mrf.mxu0 }
 0x4b0   :  { %v3273_v27 = vpop.f32.mrf.mxu0 }
 0x4b1   :  { %v3274_v49 = vadd.f32 %v3273_v27, %v3272_v1 }
 0x4b2   :  { %v3275_v23 = vpop.f32.mrf.mxu0 }
 0x4b3   :  { %v1316_v62 = vpack.c.bf16 %v3274_v49, %v3271_v43 }
 0x4b4   :  { %v3276_v22 = vpop.f32.mrf.mxu0 }
 0x4b5   :  { %3614 = vmatmul.mubr.msk.bf16.gmra.mxu1 %vm886_vm2, %v1316_v62  ;;  %v3277_v52 = vadd.f32 %v3276_v22, %v3275_v23 }
 0x4b6   :  { %v3278_v47 = vpop.f32.mrf.mxu0 }
 0x4b8   :  { %v3279_v58 = vpop.f32.mrf.mxu0 }
 0x4b9   :  { %v3280_v38 = vadd.f32 %v3279_v58, %v3278_v47 }
 0x4ba   :  { %v3281_v50 = vpop.f32.mrf.mxu0 }
 0x4bb   :  { %v1317_v63 = vpack.c.bf16 %v3280_v38, %v3277_v52 }
 0x4bc   :  { %v3282_v41 = vpop.f32.mrf.mxu0 }
 0x4bd   :  { %3617 = vmatprep.mubr.msk.bf16.mxu1 %vm886_vm2, %v1317_v63  ;;  %v3283_v45 = vadd.f32 %v3282_v41, %v3281_v50 }
 0x4be   :  { %v3284_v59 = vpop.f32.mrf.mxu0 }
 0x4c0   :  { %v3285_v18 = vpop.f32.mrf.mxu0 }
 0x4c1   :  { %v3286_v39 = vadd.f32 %v3285_v18, %v3284_v59 }
 0x4c2   :  { %v3287_v53 = vpop.f32.mrf.mxu0 }
 0x4c3   :  { %v1318_v56 = vpack.c.bf16 %v3286_v39, %v3283_v45 }
 0x4c4   :  { %v3288_v2 = vpop.f32.mrf.mxu0 }
 0x4c5   :  { %3618 = vmatmul.mubr.msk.bf16.gmra.mxu1 %vm886_vm2, %v1318_v56  ;;  %v3289_v35 = vadd.f32 %v3288_v2, %v3287_v53 }
 0x4c6   :  { %v3290_v37 = vpop.f32.mrf.mxu0 }
 0x4c8   :  { %v3291_v54 = vpop.f32.mrf.mxu0 }
 0x4c9   :  { %v3292_v32 = vadd.f32 %v3291_v54, %v3290_v37 }
 0x4ca   :  { %v3293_v42 = vpop.f32.mrf.mxu0 }
 0x4cb   :  { %v1319_v57 = vpack.c.bf16 %v3292_v32, %v3289_v35 }
 0x4cc   :  { %v3294_v51 = vpop.f32.mrf.mxu0 }
 0x4cd   :  { %3621 = vmatprep.mubr.msk.bf16.mxu1 %vm886_vm2, %v1319_v57  ;;  %v3295_v55 = vadd.f32 %v3294_v51, %v3293_v42 }
 0x4ce   :  { %v3296_v36 = vpop.f32.mrf.mxu0 }
 0x4d0   :  { %v3297_v44 = vpop.f32.mrf.mxu0 }
 0x4d1   :  { %v3298_v3 = vadd.f32 %v3297_v44, %v3296_v36 }
 0x4d3   :  { %v1320_v4 = vpack.c.bf16 %v3298_v3, %v3295_v55 }
 0x4d5   :  { %3622 = vmatmul.mubr.msk.bf16.gmra.mxu1 %vm886_vm2, %v1320_v4 }
 0x525   :  { %v3595_v5 = vpop.f32.mrf.mxu1 }
 0x526   :  { %v1435_v11 = vadd.f32 %v3595_v5, %v4422_v7 }
 0x527   :  { %v1426_v6 = vpop.f32.mrf.mxu1 }
 0x528   :  { %v1427_v9 = vadd.f32 %v4422_v7, %v1426_v6  ;;  %v1555_v17 = vmax.f32 %v1435_v11, 0.0 }
 0x529   :  { %v3596_v8 = vpop.f32.mrf.mxu1 }
 0x52a   :  { %v1438_v10 = vadd.f32 %v3596_v8, %v4422_v7  ;;  %v1553_v15 = vmax.f32 %v1427_v9, 0.0 }
 0x52b   :  { %v1429_v12 = vpop.f32.mrf.mxu1 }
 0x52c   :  { %v1430_v13 = vadd.f32 %v4422_v7, %v1429_v12  ;;  %v1556_v14 = vmax.f32 %v1438_v10, 0.0 }
 0x52e   :  { %v1554_v16 = vmax.f32 %v1430_v13, 0.0  ;;  %v1586_v20 = vpack.c.bf16 %v1556_v14, %v1555_v17 }
 0x530   :  { %v1585_v19 = vpack.c.bf16 %v1554_v16, %v1553_v15 }
 0x532   :  { %3629 = vmatprep.mubr.msk.bf16.mxu1 %vm886_vm2, %v1585_v19 }
 0x533   :  { %3630 = vmatmul.mubr.msk.bf16.vlgmr.msra.gmra.mxu1 %vm886_vm2, %v1586_v20 }
 0x535   :  { %v3599_v21 = vpop.f32.mrf.mxu1 }
 0x536   :  { %v1451_v29 = vadd.f32 %v3599_v21, %v4422_v7 }
 0x537   :  { %v1442_v60 = vpop.f32.mrf.mxu1 }
 0x538   :  { %v1443_v40 = vadd.f32 %v4422_v7, %v1442_v60  ;;  %v1559_v24 = vmax.f32 %v1451_v29, 0.0 }
 0x539   :  { %v3600_v61 = vpop.f32.mrf.mxu1 }
 0x53a   :  { %v1454_v26 = vadd.f32 %v3600_v61, %v4422_v7  ;;  %v1557_v31 = vmax.f32 %v1443_v40, 0.0 }
 0x53b   :  { %v1445_v30 = vpop.f32.mrf.mxu1 }
 0x53c   :  { %v1446_v28 = vadd.f32 %v4422_v7, %v1445_v30  ;;  %v1560_v33 = vmax.f32 %v1454_v26, 0.0 }
 0x53e   :  { %v1558_v34 = vmax.f32 %v1446_v28, 0.0  ;;  %v1588_v46 = vpack.c.bf16 %v1560_v33, %v1559_v24 }
 0x540   :  { %v1587_v25 = vpack.c.bf16 %v1558_v34, %v1557_v31 }
 0x542   :  { %3633 = vmatprep.mubr.msk.bf16.mxu1 %vm886_vm2, %v1587_v25 }
 0x543   :  { %3634 = vmatmul.mubr.msk.bf16.gmra.mxu1 %vm886_vm2, %v1588_v46 }
 0x545   :  { %v3603_v48 = vpop.f32.mrf.mxu1 }
 0x546   :  { %v1467_v49 = vadd.f32 %v3603_v48, %v4422_v7 }
 0x547   :  { %v1458_v0 = vpop.f32.mrf.mxu1 }
 0x548   :  { %v1459_v27 = vadd.f32 %v4422_v7, %v1458_v0  ;;  %v1563_v52 = vmax.f32 %v1467_v49, 0.0 }
 0x549   :  { %v3604_v1 = vpop.f32.mrf.mxu1 }
 0x54a   :  { %v1470_v43 = vadd.f32 %v3604_v1, %v4422_v7  ;;  %v1561_v47 = vmax.f32 %v1459_v27, 0.0 }
 0x54b   :  { %v1461_v23 = vpop.f32.mrf.mxu1 }
 0x54c   :  { %v1462_v62 = vadd.f32 %v4422_v7, %v1461_v23  ;;  %v1564_v22 = vmax.f32 %v1470_v43, 0.0 }
 0x54e   :  { %v1562_v58 = vmax.f32 %v1462_v62, 0.0  ;;  %v1590_v50 = vpack.c.bf16 %v1564_v22, %v1563_v52 }
 0x550   :  { %v1589_v38 = vpack.c.bf16 %v1562_v58, %v1561_v47 }
 0x552   :  { %3637 = vmatprep.mubr.msk.bf16.mxu1 %vm886_vm2, %v1589_v38 }
 0x553   :  { %3638 = vmatmul.mubr.msk.bf16.gmra.mxu1 %vm886_vm2, %v1590_v50 }
 0x555   :  { %v3607_v63 = vpop.f32.mrf.mxu1 }
 0x556   :  { %v1483_v39 = vadd.f32 %v3607_v63, %v4422_v7 }
 0x557   :  { %v1474_v41 = vpop.f32.mrf.mxu1 }
 0x558   :  { %v1475_v18 = vadd.f32 %v4422_v7, %v1474_v41  ;;  %v1567_v35 = vmax.f32 %v1483_v39, 0.0 }
 0x559   :  { %v3608_v59 = vpop.f32.mrf.mxu1 }
 0x55a   :  { %v1486_v45 = vadd.f32 %v3608_v59, %v4422_v7  ;;  %v1565_v37 = vmax.f32 %v1475_v18, 0.0 }
 0x55b   :  { %v1477_v53 = vpop.f32.mrf.mxu1 }
 0x55c   :  { %v1478_v56 = vadd.f32 %v4422_v7, %v1477_v53  ;;  %v1568_v2 = vmax.f32 %v1486_v45, 0.0 }
 0x55e   :  { %v1566_v54 = vmax.f32 %v1478_v56, 0.0  ;;  %v1592_v42 = vpack.c.bf16 %v1568_v2, %v1567_v35  ;;  %v4475_v2 = vld [vmem:[%s4731_s10] ss:$0 sm:$0xff] }
 0x560   :  { %v1591_v32 = vpack.c.bf16 %v1566_v54, %v1565_v37 }
 0x562   :  { %3641 = vmatprep.mubr.msk.bf16.mxu1 %vm886_vm2, %v1591_v32 }
 0x563   :  { %3642 = vmatmul.mubr.msk.bf16.gmra.mxu1 %vm886_vm2, %v1592_v42 }
 0x565   :  { %v3611_v57 = vpop.f32.mrf.mxu1 }
 0x566   :  { %v1499_v3 = vadd.f32 %v3611_v57, %v4422_v7 }
 0x567   :  { %v1490_v51 = vpop.f32.mrf.mxu1 }
 0x568   :  { %v1491_v44 = vadd.f32 %v4422_v7, %v1490_v51  ;;  %v1571_v10 = vmax.f32 %v1499_v3, 0.0 }
 0x569   :  { %v3612_v36 = vpop.f32.mrf.mxu1 }
 0x56a   :  { %v1502_v55 = vadd.f32 %v3612_v36, %v4422_v7  ;;  %v1569_v8 = vmax.f32 %v1491_v44, 0.0 }
 0x56b   :  { %v1493_v4 = vpop.f32.mrf.mxu1 }
 0x56c   :  { %v1494_v5 = vadd.f32 %v4422_v7, %v1493_v4  ;;  %v1572_v6 = vmax.f32 %v1502_v55, 0.0 }
 0x56e   :  { %v1570_v9 = vmax.f32 %v1494_v5, 0.0  ;;  %v1594_v12 = vpack.c.bf16 %v1572_v6, %v1571_v10 }
 0x570   :  { %v1593_v11 = vpack.c.bf16 %v1570_v9, %v1569_v8 }
 0x572   :  { %3645 = vmatprep.mubr.msk.bf16.mxu1 %vm886_vm2, %v1593_v11 }
 0x573   :  { %3646 = vmatmul.mubr.msk.bf16.gmra.mxu1 %vm886_vm2, %v1594_v12 }
 0x575   :  { %v3615_v13 = vpop.f32.mrf.mxu1 }
 0x576   :  { %v1515_v19 = vadd.f32 %v3615_v13, %v4422_v7 }
 0x577   :  { %v1506_v14 = vpop.f32.mrf.mxu1 }
 0x578   :  { %v1507_v16 = vadd.f32 %v4422_v7, %v1506_v14  ;;  %v1575_v26 = vmax.f32 %v1515_v19, 0.0 }
 0x579   :  { %v3616_v15 = vpop.f32.mrf.mxu1 }
 0x57a   :  { %v1518_v17 = vadd.f32 %v3616_v15, %v4422_v7  ;;  %v1573_v61 = vmax.f32 %v1507_v16, 0.0 }
 0x57b   :  { %v1509_v20 = vpop.f32.mrf.mxu1 }
 0x57c   :  { %v1510_v21 = vadd.f32 %v4422_v7, %v1509_v20  ;;  %v1576_v60 = vmax.f32 %v1518_v17, 0.0 }
 0x57e   :  { %v1574_v40 = vmax.f32 %v1510_v21, 0.0  ;;  %v1596_v30 = vpack.c.bf16 %v1576_v60, %v1575_v26 }
 0x580   :  { %v1595_v29 = vpack.c.bf16 %v1574_v40, %v1573_v61 }
 0x582   :  { %3649 = vmatprep.mubr.msk.bf16.mxu1 %vm886_vm2, %v1595_v29 }
 0x583   :  { %3650 = vmatmul.mubr.msk.bf16.gmra.mxu1 %vm886_vm2, %v1596_v30 }
 0x585   :  { %v3619_v28 = vpop.f32.mrf.mxu1 }
 0x586   :  { %v1531_v25 = vadd.f32 %v3619_v28, %v4422_v7 }
 0x587   :  { %v1522_v33 = vpop.f32.mrf.mxu1 }
 0x588   :  { %v1523_v34 = vadd.f32 %v4422_v7, %v1522_v33  ;;  %v1579_v43 = vmax.f32 %v1531_v25, 0.0 }
 0x589   :  { %v3620_v31 = vpop.f32.mrf.mxu1 }
 0x58a   :  { %v1534_v24 = vadd.f32 %v3620_v31, %v4422_v7  ;;  %v1577_v1 = vmax.f32 %v1523_v34, 0.0 }
 0x58b   :  { %v1525_v46 = vpop.f32.mrf.mxu1 }
 0x58c   :  { %v1526_v48 = vadd.f32 %v4422_v7, %v1525_v46  ;;  %v1580_v0 = vmax.f32 %v1534_v24, 0.0 }
 0x58e   :  { %v1578_v27 = vmax.f32 %v1526_v48, 0.0  ;;  %v1598_v23 = vpack.c.bf16 %v1580_v0, %v1579_v43 }
 0x590   :  { %v1597_v49 = vpack.c.bf16 %v1578_v27, %v1577_v1 }
 0x592   :  { %3653 = vmatprep.mubr.msk.bf16.mxu1 %vm886_vm2, %v1597_v49 }
 0x593   :  { %3654 = vmatmul.mubr.msk.bf16.gmra.mxu1 %vm886_vm2, %v1598_v23 }
 0x595   :  { %v3623_v62 = vpop.f32.mrf.mxu1 }
 0x596   :  { %v1547_v38 = vadd.f32 %v3623_v62, %v4422_v7 }
 0x597   :  { %v1538_v22 = vpop.f32.mrf.mxu1 }
 0x598   :  { %v1539_v58 = vadd.f32 %v4422_v7, %v1538_v22  ;;  %v1583_v45 = vmax.f32 %v1547_v38, 0.0 }
 0x599   :  { %v3624_v47 = vpop.f32.mrf.mxu1 }
 0x59a   :  { %v1550_v52 = vadd.f32 %v3624_v47, %v4422_v7  ;;  %v1581_v59 = vmax.f32 %v1539_v58, 0.0 }
 0x59b   :  { %v1541_v50 = vpop.f32.mrf.mxu1 }
 0x59c   :  { %v1542_v63 = vadd.f32 %v4422_v7, %v1541_v50  ;;  %v1584_v41 = vmax.f32 %v1550_v52, 0.0 }
 0x59e   :  { %v1582_v18 = vmax.f32 %v1542_v63, 0.0  ;;  %v1600_v53 = vpack.c.bf16 %v1584_v41, %v1583_v45 }
 0x5a0   :  { %v1599_v39 = vpack.c.bf16 %v1582_v18, %v1581_v59 }
 0x5a2   :  { %3657 = vmatprep.mubr.msk.bf16.mxu1 %vm886_vm2, %v1599_v39 }
 0x5a3   :  { %3658 = vmatmul.mubr.msk.bf16.gmra.mxu1 %vm886_vm2, %v1600_v53 }
 0x5f3   :  { %v3631_v56 = vpop.f32.mrf.mxu1 }
 0x5f4   :  { %v1715_v54 = vadd.f32 %v3631_v56, %v4475_v2 }
 0x5f5   :  { %v1706_v37 = vpop.f32.mrf.mxu1 }
 0x5f6   :  { %v1707_v35 = vadd.f32 %v4475_v2, %v1706_v37  ;;  %v1835_v57 = vmax.f32 %v1715_v54, 0.0 }
 0x5f7   :  { %v3632_v7 = vpop.f32.mrf.mxu1 }
 0x5f8   :  { %v1718_v32 = vadd.f32 %v3632_v7, %v4475_v2  ;;  %v1833_v44 = vmax.f32 %v1707_v35, 0.0 }
 0x5f9   :  { %v1709_v42 = vpop.f32.mrf.mxu1 }
 0x5fa   :  { %v1836_v51 = vmax.f32 %v1718_v32, 0.0  ;;  %v1710_v36 = vadd.f32 %v4475_v2, %v1709_v42 }
 0x5fc   :  { %v4481_v55 = vpack.c.bf16 %v1836_v51, %v1835_v57  ;;  %v1834_v3 = vmax.f32 %v1710_v36, 0.0 }
 0x5fe   :  { %v4483_v4 = vpack.c.bf16 %v1834_v3, %v1833_v44 }
 0x603   :  { %v3635_v5 = vpop.f32.mrf.mxu1 }
 0x604   :  { %v1731_v8 = vadd.f32 %v3635_v5, %v4475_v2 }
 0x605   :  { %v1722_v6 = vpop.f32.mrf.mxu1 }
 0x606   :  { %v1723_v10 = vadd.f32 %v4475_v2, %v1722_v6  ;;  %v1839_v13 = vmax.f32 %v1731_v8, 0.0 }
 0x607   :  { %v3636_v9 = vpop.f32.mrf.mxu1 }
 0x608   :  { %v1734_v11 = vadd.f32 %v3636_v9, %v4475_v2  ;;  %v1837_v16 = vmax.f32 %v1723_v10, 0.0 }
 0x609   :  { %v1725_v12 = vpop.f32.mrf.mxu1 }
 0x60a   :  { %v1840_v14 = vmax.f32 %v1734_v11, 0.0  ;;  %v1726_v15 = vadd.f32 %v4475_v2, %v1725_v12 }
 0x60c   :  { %v4489_v17 = vpack.c.bf16 %v1840_v14, %v1839_v13  ;;  %v1838_v19 = vmax.f32 %v1726_v15, 0.0 }
 0x60e   :  { %v4491_v20 = vpack.c.bf16 %v1838_v19, %v1837_v16 }
 0x613   :  { %v3639_v21 = vpop.f32.mrf.mxu1 }
 0x614   :  { %v1747_v5 = vadd.f32 %v3639_v21, %v4475_v2 }
 0x615   :  { %v1738_v60 = vpop.f32.mrf.mxu1 }
 0x616   :  { %v1843_v16 = vmax.f32 %v1747_v5, 0.0  ;;  %v1739_v19 = vadd.f32 %v4475_v2, %v1738_v60  ;;  %v3865_v5 = vld [vmem:[#allocation2 + $0xd4] ss:$8 sps:$4 sm:$0xff]  }
 0x617   :  { %v3640_v61 = vpop.f32.mrf.mxu1 }
 0x618   :  { %v1750_v42 = vadd.f32 %v3640_v61, %v4475_v2 }
 0x619   :  { %v1741_v40 = vpop.f32.mrf.mxu1 }
 0x61a   :  { %v1844_v10 = vmax.f32 %v1750_v42, 0.0  ;;  %v1742_v11 = vadd.f32 %v4475_v2, %v1741_v40  ;;  %v1841_v40 = vmax.f32 %v1739_v19, 0.0  ;;  %v3827_v42 = vld [vmem:[%s4732_s11] sm:$0xff]  }
 0x623   :  { %v3643_v26 = vpop.f32.mrf.mxu1 }
 0x624   :  { %v1763_v58 = vadd.f32 %v3643_v26, %v4475_v2  ;;  %v1870_v26 = vpack.c.bf16 %v1844_v10, %v1843_v16  ;;  %v3869_v10 = vld [vmem:[#allocation2 + $0xf4] ss:$8 sps:$4 sm:$0xff]  }
 0x625   :  { %v1754_v29 = vpop.f32.mrf.mxu1 }
 0x626   :  { %v1847_v56 = vmax.f32 %v1763_v58, 0.0  ;;  %v1755_v37 = vadd.f32 %v4475_v2, %v1754_v29  ;;  %v1842_v29 = vmax.f32 %v1742_v11, 0.0  ;;  %v3870_v11 = vld [vmem:[#allocation2 + $0xf0] ss:$8 sps:$4 sm:$0xff]  }
 0x627   :  { %v3644_v30 = vpop.f32.mrf.mxu1 }
 0x628   :  { %v1766_v62 = vadd.f32 %v3644_v30, %v4475_v2  ;;  %v1845_v6 = vmax.f32 %v1755_v37, 0.0  ;;  %v3856_v37 = vld [vmem:[#allocation2 + $0x80] ss:$8 sps:$4 sm:$0xff]  }
 0x629   :  { %v1757_v28 = vpop.f32.mrf.mxu1 }
 0x62a   :  { %v1848_v63 = vmax.f32 %v1766_v62, 0.0  ;;  %v1758_v41 = vadd.f32 %v4475_v2, %v1757_v28 }
 0x62c   :  { %v1872_v57 = vpack.c.bf16 %v1848_v63, %v1847_v56  ;;  %v1846_v51 = vmax.f32 %v1758_v41, 0.0  ;;  %v3845_v63 = vld [vmem:[#allocation2 + $0x34] ss:$8 sps:$4 sm:$0xff]   ;;  %v3847_v41 = vld [vmem:[#allocation2 + $0x44] ss:$8 sps:$4 sm:$0xff]  }
 0x62d   :  { %v3855_v56 = vld [vmem:[#allocation2 + $0x84] ss:$8 sps:$4 sm:$0xff]  }
 0x62e   :  { %v1871_v12 = vpack.c.bf16 %v1846_v51, %v1845_v6  ;;  %v3861_v51 = vld [vmem:[#allocation2 + $0xb4] ss:$8 sps:$4 sm:$0xff]   ;;  %v3866_v6 = vld [vmem:[#allocation2 + $0xd0] ss:$8 sps:$4 sm:$0xff]  }
 0x633   :  { %v4493_v33 = vpop.f32.mrf.mxu1 }
 0x635   :  { %v4495_v31 = vpop.f32.mrf.mxu1 }
 0x636   :  { %v1771_v58 = vadd.f32 %v4475_v2, %v4495_v31  ;;  %v3844_v31 = vld [vmem:[#allocation2 + $0x20] ss:$8 sps:$4 sm:$0xff]  }
 0x637   :  { %v4497_v34 = vpop.f32.mrf.mxu1 }
 0x638   :  { %v1782_v60 = vadd.f32 %v4497_v34, %v4475_v2 }
 0x639   :  { %v4499_v24 = vpop.f32.mrf.mxu1 }
 0x643   :  { %v3651_v25 = vpop.f32.mrf.mxu1 }
 0x644   :  { %v1795_v21 = vadd.f32 %v3651_v25, %v4475_v2 }
 0x645   :  { %v1786_v46 = vpop.f32.mrf.mxu1 }
 0x647   :  { %v3652_v48 = vpop.f32.mrf.mxu1 }
 0x648   :  { %v1798_v13 = vadd.f32 %v3652_v48, %v4475_v2  ;;  %v1787_v48 = vadd.f32 %v4475_v2, %v1786_v46 }
 0x649   :  { %v1789_v0 = vpop.f32.mrf.mxu1 }
 0x64a   :  { %v1856_v30 = vmax.f32 %v1798_v13, 0.0  ;;  %v1790_v28 = vadd.f32 %v4475_v2, %v1789_v0  ;;  %v1853_v62 = vmax.f32 %v1787_v48, 0.0  ;;  %v1852_v0 = vmax.f32 %v1782_v60, 0.0 }
 0x64c   :  { %v1854_v25 = vmax.f32 %v1790_v28, 0.0 }
 0x653   :  { %v3655_v1 = vpop.f32.mrf.mxu1 }
 0x654   :  { %v1811_v54 = vadd.f32 %v3655_v1, %v4475_v2 }
 0x655   :  { %v1802_v27 = vpop.f32.mrf.mxu1 }
 0x656   :  { %v1859_v8 = vmax.f32 %v1811_v54, 0.0  ;;  %v1803_v9 = vadd.f32 %v4475_v2, %v1802_v27  ;;  %v1855_v27 = vmax.f32 %v1795_v21, 0.0  ;;  %v3857_v54 = vld [vmem:[#allocation2 + $0x94] ss:$8 sps:$4 sm:$0xff]  }
 0x657   :  { %v3656_v43 = vpop.f32.mrf.mxu1 }
 0x658   :  { %v1814_v18 = vadd.f32 %v3656_v43, %v4475_v2  ;;  %v1857_v61 = vmax.f32 %v1803_v9, 0.0  ;;  %v1869_v43 = vpack.c.bf16 %v1842_v29, %v1841_v40  ;;  %v3868_v9 = vld [vmem:[#allocation2 + $0xe0] ss:$8 sps:$4 sm:$0xff]  }
 0x659   :  { %v1805_v49 = vpop.f32.mrf.mxu1 }
 0x65a   :  { %v1860_v36 = vmax.f32 %v1814_v18, 0.0  ;;  %v1806_v44 = vadd.f32 %v4475_v2, %v1805_v49  ;;  %v1876_v49 = vpack.c.bf16 %v1856_v30, %v1855_v27  ;;  %v3851_v18 = vld [vmem:[#allocation2 + $0x64] ss:$8 sps:$4 sm:$0xff]  }
 0x65c   :  { %v1878_v14 = vpack.c.bf16 %v1860_v36, %v1859_v8  ;;  %v1858_v15 = vmax.f32 %v1806_v44, 0.0  ;;  %v3862_v36 = vld [vmem:[#allocation2 + $0xb0] ss:$8 sps:$4 sm:$0xff]   ;;  %v3863_v44 = vld [vmem:[#allocation2 + $0xc4] ss:$8 sps:$4 sm:$0xff]  }
 0x65d   :  { %v3867_v8 = vld [vmem:[#allocation2 + $0xe4] ss:$8 sps:$4 sm:$0xff]  }
 0x65e   :  { %v1877_v1 = vpack.c.bf16 %v1858_v15, %v1857_v61 }
 0x663   :  { %v3659_v23 = vpop.f32.mrf.mxu1 }
 0x664   :  { %v1827_v47 = vadd.f32 %v3659_v23, %v4475_v2  ;;  %v1779_v23 = vadd.f32 %v4493_v33, %v4475_v2 }
 0x665   :  { %v1818_v22 = vpop.f32.mrf.mxu1 }
 0x666   :  { %v1819_v38 = vadd.f32 %v4475_v2, %v1818_v22  ;;  %v1863_v45 = vmax.f32 %v1827_v47, 0.0  ;;  %v1774_v22 = vadd.f32 %v4475_v2, %v4499_v24  ;;  %v1875_v47 = vpack.c.bf16 %v1854_v25, %v1853_v62  ;;  %v3840_v24 = vld [vmem:[#allocation2] ss:$8 sps:$4 sm:$0xff]  }
 0x667   :  { %v3660_v52 = vpop.f32.mrf.mxu1  ;;  %v1851_v46 = vmax.f32 %v1779_v23, 0.0 }
 0x668   :  { %v1830_v50 = vadd.f32 %v3660_v52, %v4475_v2  ;;  %v1861_v7 = vmax.f32 %v1819_v38, 0.0  ;;  %v1850_v52 = vmax.f32 %v1774_v22, 0.0  ;;  %v1849_v38 = vmax.f32 %v1771_v58, 0.0 }
 0x669   :  { %v1821_v59 = vpop.f32.mrf.mxu1  ;;  %v1874_v34 = vpack.c.bf16 %v1852_v0, %v1851_v46 }
 0x66a   :  { %v1864_v39 = vmax.f32 %v1830_v50, 0.0  ;;  %v1822_v53 = vadd.f32 %v4475_v2, %v1821_v59  ;;  %v1873_v33 = vpack.c.bf16 %v1850_v52, %v1849_v38  ;;  %v3842_v50 = vld [vmem:[#allocation2 + $0x10] ss:$8 sps:$4 sm:$0xff]   ;;  %v3843_v2 = vld [vmem:[#allocation2 + $0x24] ss:$8 sps:$4 sm:$0xff]  }
 0x66b   :  { %v3849_v59 = vld [vmem:[#allocation2 + $0x54] ss:$8 sps:$4 sm:$0xff]  }
 0x66c   :  { %v1880_v35 = vpack.c.bf16 %v1864_v39, %v1863_v45  ;;  %v1862_v32 = vmax.f32 %v1822_v53, 0.0  ;;  %v3852_v45 = vld [vmem:[#allocation2 + $0x60] ss:$8 sps:$4 sm:$0xff]   ;;  %v3853_v39 = vld [vmem:[#allocation2 + $0x74] ss:$8 sps:$4 sm:$0xff]  }
 0x66d   :  { %v3854_v53 = vld [vmem:[#allocation2 + $0x70] ss:$8 sps:$4 sm:$0xff]  }
 0x66e   :  { %v1879_v3 = vpack.c.bf16 %v1862_v32, %v1861_v7  ;;  %3335 = vmatprep.subr.bf16.mxu0 %v1880_v35  ;;  %v3858_v7 = vld [vmem:[#allocation2 + $0x90] ss:$8 sps:$4 sm:$0xff]   ;;  %v3859_v35 = vld [vmem:[#allocation2 + $0xa4] ss:$8 sps:$4 sm:$0xff]  }
 0x66f   :  { %3336 = vmatpush3.bf16.msra.mxu0 %v1872_v57  ;;  %v3826_v32 = vld [vmem:[%s4732_s11 + $0x8] sm:$0xff]  }
 0x670   :  { %3337 = vmatprep.subr.bf16.mxu0 %v1879_v3  ;;  %3661 = vmatprep.subr.bf16.mxu1 %v3826_v32  ;;  %v3860_v57 = vld [vmem:[#allocation2 + $0xa0] ss:$8 sps:$4 sm:$0xff]  }
 0x671   :  { %3662 = vmatpush3.bf16.msra.mxu1 %v3826_v32  ;;  %v3864_v3 = vld [vmem:[#allocation2 + $0xc0] ss:$8 sps:$4 sm:$0xff]  }
 0x672   :  { %3663 = vmatprep.subr.bf16.mxu1 %v3827_v42 }
 0x673   :  { %3338 = vmatpush3.bf16.msra.mxu0 %v1871_v12 }
 0x674   :  { %3339 = vmatprep.subr.bf16.mxu0 %v1878_v14 }
 0x675   :  { %3664 = vmatpush3.bf16.msra.mxu1 %v3827_v42 }
 0x677   :  { %3340 = vmatpush3.bf16.msra.mxu0 %v1870_v26 }
 0x678   :  { %3341 = vmatprep.subr.bf16.mxu0 %v1877_v1 }
 0x67b   :  { %3342 = vmatpush3.bf16.msra.mxu0 %v1869_v43 }
 0x67c   :  { %3343 = vmatprep.subr.bf16.mxu0 %v1876_v49 }
 0x67f   :  { %3344 = vmatpush3.bf16.msra.mxu0 %v4489_v17  ;;  %v3841_v17 = vld [vmem:[#allocation2 + $0x14] ss:$8 sps:$4 sm:$0xff]  }
 0x680   :  { %3345 = vmatprep.subr.bf16.mxu0 %v1875_v47 }
 0x683   :  { %3346 = vmatpush3.bf16.msra.mxu0 %v4491_v20  ;;  %v3846_v20 = vld [vmem:[#allocation2 + $0x30] ss:$8 sps:$4 sm:$0xff]  }
 0x684   :  { %3347 = vmatprep.subr.bf16.mxu0 %v1874_v34 }
 0x687   :  { %3348 = vmatpush3.bf16.msra.mxu0 %v4481_v55  ;;  %v3848_v55 = vld [vmem:[#allocation2 + $0x40] ss:$8 sps:$4 sm:$0xff]  }
 0x688   :  { %3349 = vmatprep.subr.bf16.mxu0 %v1873_v33 }
 0x68b   :  { %3350 = vmatpush3.bf16.msra.mxu0 %v4483_v4  ;;  %v3850_v4 = vld [vmem:[#allocation2 + $0x50] ss:$8 sps:$4 sm:$0xff]  }
 0x68e   :  { %1914 = vmatmul.mubr.bf16.vlgmr.msra.gmra.mxu0 %v3840_v24 }
 0x68f   :  { %1921 = vmatprep.mubr.bf16.mxu0 %v3841_v17 }
 0x696   :  { %1922 = vmatmul.mubr.bf16.gmra.mxu0 %v3842_v50 }
 0x697   :  { %1929 = vmatprep.mubr.bf16.mxu0 %v3843_v2 }
 0x69e   :  { %1930 = vmatmul.mubr.bf16.gmra.mxu0 %v3844_v31 }
 0x69f   :  { %1937 = vmatprep.mubr.bf16.mxu0 %v3845_v63 }
 0x6a6   :  { %1938 = vmatmul.mubr.bf16.gmra.mxu0 %v3846_v20 }
 0x6a7   :  { %1945 = vmatprep.mubr.bf16.mxu0 %v3847_v41 }
 0x6ae   :  { %1946 = vmatmul.mubr.bf16.gmra.mxu0 %v3848_v55 }
 0x6af   :  { %1953 = vmatprep.mubr.bf16.mxu0 %v3849_v59 }
 0x6b6   :  { %1954 = vmatmul.mubr.bf16.gmra.mxu0 %v3850_v4 }
 0x6b7   :  { %1961 = vmatprep.mubr.bf16.mxu0 %v3851_v18 }
 0x6be   :  { %1962 = vmatmul.mubr.bf16.gmra.mxu0 %v3852_v45 }
 0x6bf   :  { %1969 = vmatprep.mubr.bf16.mxu0 %v3853_v39 }
 0x6c6   :  { %1970 = vmatmul.mubr.bf16.gmra.mxu0 %v3854_v53 }
 0x6c7   :  { %1977 = vmatprep.mubr.bf16.mxu0 %v3855_v56 }
 0x6ce   :  { %1978 = vmatmul.mubr.bf16.gmra.mxu0 %v3856_v37 }
 0x6cf   :  { %1985 = vmatprep.mubr.bf16.mxu0 %v3857_v54 }
 0x6d6   :  { %1986 = vmatmul.mubr.bf16.gmra.mxu0 %v3858_v7 }
 0x6d7   :  { %1993 = vmatprep.mubr.bf16.mxu0 %v3859_v35 }
 0x6de   :  { %1994 = vmatmul.mubr.bf16.gmra.mxu0 %v3860_v57 }
 0x6df   :  { %2001 = vmatprep.mubr.bf16.mxu0 %v3861_v51 }
 0x6e6   :  { %2002 = vmatmul.mubr.bf16.gmra.mxu0 %v3862_v36 }
 0x6e7   :  { %2009 = vmatprep.mubr.bf16.mxu0 %v3863_v44 }
 0x6ee   :  { %2010 = vmatmul.mubr.bf16.gmra.mxu0 %v3864_v3 }
 0x6ef   :  { %2017 = vmatprep.mubr.bf16.mxu0 %v3865_v5 }
 0x6f6   :  { %2018 = vmatmul.mubr.bf16.gmra.mxu0 %v3866_v6 }
 0x6f7   :  { %2025 = vmatprep.mubr.bf16.mxu0 %v3867_v8 }
 0x6fe   :  { %2026 = vmatmul.mubr.bf16.gmra.mxu0 %v3868_v9 }
 0x6ff   :  { %2033 = vmatprep.mubr.bf16.mxu0 %v3869_v10 }
 0x706   :  { %2034 = vmatmul.mubr.bf16.gmra.mxu0 %v3870_v11 }
 0x74e   :  { %v3351_v12 = vpop.f32.mrf.mxu0 }
 0x750   :  { %v3352_v13 = vpop.f32.mrf.mxu0 }
 0x751   :  { %v3353_v16 = vadd.f32 %v3352_v13, %v3351_v12 }
 0x752   :  { %v3354_v14 = vpop.f32.mrf.mxu0 }
 0x754   :  { %v3355_v15 = vpop.f32.mrf.mxu0 }
 0x755   :  { %v3356_v19 = vadd.f32 %v3355_v15, %v3354_v14 }
 0x756   :  { %v3357_v21 = vpop.f32.mrf.mxu0 }
 0x757   :  { %v2042_v61 = vpack.c.bf16 %v3356_v19, %v3353_v16 }
 0x758   :  { %v3358_v26 = vpop.f32.mrf.mxu0 }
 0x759   :  { %3665 = vmatprep.mubr.msk.bf16.mxu1 %vm886_vm2, %v2042_v61  ;;  %v3359_v28 = vadd.f32 %v3358_v26, %v3357_v21 }
 0x75a   :  { %v3360_v29 = vpop.f32.mrf.mxu0 }
 0x75c   :  { %v3361_v30 = vpop.f32.mrf.mxu0 }
 0x75d   :  { %v3362_v1 = vadd.f32 %v3361_v30, %v3360_v29 }
 0x75e   :  { %v3363_v40 = vpop.f32.mrf.mxu0 }
 0x75f   :  { %v2043_v27 = vpack.c.bf16 %v3362_v1, %v3359_v28  ;;  %v3828_v1 = vld [vmem:[%s4734_s13 + $0x8] sm:$0xff]  }
 0x760   :  { %v3364_v48 = vpop.f32.mrf.mxu0  ;;  %3697 = vmatprep.subr.bf16.mxu1 %v3828_v1 }
 0x761   :  { %3666 = vmatmul.mubr.msk.bf16.vlgmr.msra.gmra.mxu1 %vm886_vm2, %v2043_v27  ;;  %v3365_v49 = vadd.f32 %v3364_v48, %v3363_v40 }
 0x762   :  { %v3366_v43 = vpop.f32.mrf.mxu0  ;;  %3698 = vmatpush3.bf16.msra.mxu1 %v3828_v1 }
 0x764   :  { %v3367_v60 = vpop.f32.mrf.mxu0 }
 0x765   :  { %v3368_v25 = vadd.f32 %v3367_v60, %v3366_v43  ;;  %v3829_v43 = vld [vmem:[%s4734_s13] sm:$0xff]  }
 0x766   :  { %v3369_v23 = vpop.f32.mrf.mxu0  ;;  %3699 = vmatprep.subr.bf16.mxu1 %v3829_v43 }
 0x767   :  { %v2044_v62 = vpack.c.bf16 %v3368_v25, %v3365_v49  ;;  %3700 = vmatpush3.bf16.msra.mxu1 %v3829_v43 }
 0x768   :  { %v3370_v0 = vpop.f32.mrf.mxu0 }
 0x769   :  { %3669 = vmatprep.mubr.msk.bf16.mxu1 %vm886_vm2, %v2044_v62  ;;  %v3371_v46 = vadd.f32 %v3370_v0, %v3369_v23 }
 0x76a   :  { %v3372_v22 = vpop.f32.mrf.mxu0 }
 0x76c   :  { %v3373_v47 = vpop.f32.mrf.mxu0 }
 0x76d   :  { %v3374_v58 = vadd.f32 %v3373_v47, %v3372_v22 }
 0x76e   :  { %v3375_v34 = vpop.f32.mrf.mxu0 }
 0x76f   :  { %v2045_v52 = vpack.c.bf16 %v3374_v58, %v3371_v46 }
 0x770   :  { %v3376_v38 = vpop.f32.mrf.mxu0 }
 0x771   :  { %3670 = vmatmul.mubr.msk.bf16.gmra.mxu1 %vm886_vm2, %v2045_v52  ;;  %v3377_v17 = vadd.f32 %v3376_v38, %v3375_v34 }
 0x772   :  { %v3378_v33 = vpop.f32.mrf.mxu0 }
 0x774   :  { %v3379_v24 = vpop.f32.mrf.mxu0 }
 0x775   :  { %v3380_v50 = vadd.f32 %v3379_v24, %v3378_v33 }
 0x776   :  { %v3381_v2 = vpop.f32.mrf.mxu0 }
 0x777   :  { %v2046_v31 = vpack.c.bf16 %v3380_v50, %v3377_v17 }
 0x778   :  { %v3382_v63 = vpop.f32.mrf.mxu0 }
 0x779   :  { %3673 = vmatprep.mubr.msk.bf16.mxu1 %vm886_vm2, %v2046_v31  ;;  %v3383_v55 = vadd.f32 %v3382_v63, %v3381_v2 }
 0x77a   :  { %v3384_v20 = vpop.f32.mrf.mxu0 }
 0x77c   :  { %v3385_v41 = vpop.f32.mrf.mxu0 }
 0x77d   :  { %v3386_v59 = vadd.f32 %v3385_v41, %v3384_v20 }
 0x77e   :  { %v3387_v4 = vpop.f32.mrf.mxu0 }
 0x77f   :  { %v2047_v18 = vpack.c.bf16 %v3386_v59, %v3383_v55 }
 0x780   :  { %v3388_v45 = vpop.f32.mrf.mxu0 }
 0x781   :  { %3674 = vmatmul.mubr.msk.bf16.gmra.mxu1 %vm886_vm2, %v2047_v18  ;;  %v3389_v56 = vadd.f32 %v3388_v45, %v3387_v4 }
 0x782   :  { %v3390_v39 = vpop.f32.mrf.mxu0 }
 0x784   :  { %v3391_v53 = vpop.f32.mrf.mxu0 }
 0x785   :  { %v3392_v37 = vadd.f32 %v3391_v53, %v3390_v39 }
 0x786   :  { %v3393_v54 = vpop.f32.mrf.mxu0 }
 0x787   :  { %v2048_v7 = vpack.c.bf16 %v3392_v37, %v3389_v56 }
 0x788   :  { %v3394_v35 = vpop.f32.mrf.mxu0 }
 0x789   :  { %3677 = vmatprep.mubr.msk.bf16.mxu1 %vm886_vm2, %v2048_v7  ;;  %v3395_v57 = vadd.f32 %v3394_v35, %v3393_v54 }
 0x78a   :  { %v3396_v32 = vpop.f32.mrf.mxu0 }
 0x78c   :  { %v3397_v42 = vpop.f32.mrf.mxu0 }
 0x78d   :  { %v3398_v51 = vadd.f32 %v3397_v42, %v3396_v32  ;;  %v4564_v42 = vld [vmem:[%s4733_s12] ss:$0 sm:$0xff] }
 0x78e   :  { %v3399_v36 = vpop.f32.mrf.mxu0 }
 0x78f   :  { %v2049_v44 = vpack.c.bf16 %v3398_v51, %v3395_v57 }
 0x790   :  { %v3400_v3 = vpop.f32.mrf.mxu0 }
 0x791   :  { %3678 = vmatmul.mubr.msk.bf16.gmra.mxu1 %vm886_vm2, %v2049_v44  ;;  %v3401_v8 = vadd.f32 %v3400_v3, %v3399_v36 }
 0x792   :  { %v3402_v5 = vpop.f32.mrf.mxu0 }
 0x794   :  { %v3403_v6 = vpop.f32.mrf.mxu0 }
 0x795   :  { %v3404_v9 = vadd.f32 %v3403_v6, %v3402_v5 }
 0x796   :  { %v3405_v10 = vpop.f32.mrf.mxu0 }
 0x797   :  { %v2050_v11 = vpack.c.bf16 %v3404_v9, %v3401_v8 }
 0x798   :  { %v3406_v12 = vpop.f32.mrf.mxu0 }
 0x799   :  { %3681 = vmatprep.mubr.msk.bf16.mxu1 %vm886_vm2, %v2050_v11  ;;  %v3407_v15 = vadd.f32 %v3406_v12, %v3405_v10 }
 0x79a   :  { %v3408_v13 = vpop.f32.mrf.mxu0 }
 0x79c   :  { %v3409_v14 = vpop.f32.mrf.mxu0 }
 0x79d   :  { %v3410_v16 = vadd.f32 %v3409_v14, %v3408_v13 }
 0x79e   :  { %v3411_v19 = vpop.f32.mrf.mxu0 }
 0x79f   :  { %v2051_v21 = vpack.c.bf16 %v3410_v16, %v3407_v15 }
 0x7a0   :  { %v3412_v61 = vpop.f32.mrf.mxu0 }
 0x7a1   :  { %3682 = vmatmul.mubr.msk.bf16.gmra.mxu1 %vm886_vm2, %v2051_v21  ;;  %v3413_v30 = vadd.f32 %v3412_v61, %v3411_v19 }
 0x7a2   :  { %v3414_v26 = vpop.f32.mrf.mxu0 }
 0x7a4   :  { %v3415_v29 = vpop.f32.mrf.mxu0 }
 0x7a5   :  { %v3416_v28 = vadd.f32 %v3415_v29, %v3414_v26 }
 0x7a6   :  { %v3417_v40 = vpop.f32.mrf.mxu0 }
 0x7a7   :  { %v2052_v27 = vpack.c.bf16 %v3416_v28, %v3413_v30 }
 0x7a8   :  { %v3418_v48 = vpop.f32.mrf.mxu0 }
 0x7a9   :  { %3685 = vmatprep.mubr.msk.bf16.mxu1 %vm886_vm2, %v2052_v27  ;;  %v3419_v25 = vadd.f32 %v3418_v48, %v3417_v40 }
 0x7aa   :  { %v3420_v60 = vpop.f32.mrf.mxu0 }
 0x7ac   :  { %v3421_v49 = vpop.f32.mrf.mxu0 }
 0x7ad   :  { %v3422_v23 = vadd.f32 %v3421_v49, %v3420_v60 }
 0x7ae   :  { %v3423_v62 = vpop.f32.mrf.mxu0 }
 0x7af   :  { %v2053_v0 = vpack.c.bf16 %v3422_v23, %v3419_v25 }
 0x7b0   :  { %v3424_v22 = vpop.f32.mrf.mxu0 }
 0x7b1   :  { %3686 = vmatmul.mubr.msk.bf16.gmra.mxu1 %vm886_vm2, %v2053_v0  ;;  %v3425_v58 = vadd.f32 %v3424_v22, %v3423_v62 }
 0x7b2   :  { %v3426_v47 = vpop.f32.mrf.mxu0 }
 0x7b4   :  { %v3427_v46 = vpop.f32.mrf.mxu0 }
 0x7b5   :  { %v3428_v34 = vadd.f32 %v3427_v46, %v3426_v47 }
 0x7b6   :  { %v3429_v52 = vpop.f32.mrf.mxu0 }
 0x7b7   :  { %v2054_v38 = vpack.c.bf16 %v3428_v34, %v3425_v58 }
 0x7b8   :  { %v3430_v33 = vpop.f32.mrf.mxu0 }
 0x7b9   :  { %3689 = vmatprep.mubr.msk.bf16.mxu1 %vm886_vm2, %v2054_v38  ;;  %v3431_v50 = vadd.f32 %v3430_v33, %v3429_v52 }
 0x7ba   :  { %v3432_v24 = vpop.f32.mrf.mxu0 }
 0x7bc   :  { %v3433_v17 = vpop.f32.mrf.mxu0 }
 0x7bd   :  { %v3434_v2 = vadd.f32 %v3433_v17, %v3432_v24 }
 0x7be   :  { %v3435_v31 = vpop.f32.mrf.mxu0 }
 0x7bf   :  { %v2055_v63 = vpack.c.bf16 %v3434_v2, %v3431_v50 }
 0x7c0   :  { %v3436_v20 = vpop.f32.mrf.mxu0 }
 0x7c1   :  { %3690 = vmatmul.mubr.msk.bf16.gmra.mxu1 %vm886_vm2, %v2055_v63  ;;  %v3437_v59 = vadd.f32 %v3436_v20, %v3435_v31 }
 0x7c2   :  { %v3438_v41 = vpop.f32.mrf.mxu0 }
 0x7c4   :  { %v3439_v55 = vpop.f32.mrf.mxu0 }
 0x7c5   :  { %v3440_v4 = vadd.f32 %v3439_v55, %v3438_v41 }
 0x7c6   :  { %v3441_v18 = vpop.f32.mrf.mxu0 }
 0x7c7   :  { %v2056_v45 = vpack.c.bf16 %v3440_v4, %v3437_v59 }
 0x7c8   :  { %v3442_v39 = vpop.f32.mrf.mxu0 }
 0x7c9   :  { %3693 = vmatprep.mubr.msk.bf16.mxu1 %vm886_vm2, %v2056_v45  ;;  %v3443_v37 = vadd.f32 %v3442_v39, %v3441_v18 }
 0x7ca   :  { %v3444_v53 = vpop.f32.mrf.mxu0 }
 0x7cc   :  { %v3445_v56 = vpop.f32.mrf.mxu0 }
 0x7cd   :  { %v3446_v54 = vadd.f32 %v3445_v56, %v3444_v53 }
 0x7cf   :  { %v2057_v7 = vpack.c.bf16 %v3446_v54, %v3443_v37 }
 0x7d1   :  { %3694 = vmatmul.mubr.msk.bf16.gmra.mxu1 %vm886_vm2, %v2057_v7 }
 0x821   :  { %v3667_v35 = vpop.f32.mrf.mxu1 }
 0x822   :  { %v2172_v44 = vadd.f32 %v3667_v35, %v4564_v42 }
 0x823   :  { %v2163_v32 = vpop.f32.mrf.mxu1 }
 0x824   :  { %v2164_v51 = vadd.f32 %v4564_v42, %v2163_v32  ;;  %v2292_v10 = vmax.f32 %v2172_v44, 0.0 }
 0x825   :  { %v3668_v57 = vpop.f32.mrf.mxu1 }
 0x826   :  { %v2175_v36 = vadd.f32 %v3668_v57, %v4564_v42  ;;  %v2290_v8 = vmax.f32 %v2164_v51, 0.0 }
 0x827   :  { %v2166_v3 = vpop.f32.mrf.mxu1 }
 0x828   :  { %v2167_v5 = vadd.f32 %v4564_v42, %v2166_v3  ;;  %v2293_v6 = vmax.f32 %v2175_v36, 0.0 }
 0x82a   :  { %v2291_v9 = vmax.f32 %v2167_v5, 0.0  ;;  %v2323_v12 = vpack.c.bf16 %v2293_v6, %v2292_v10 }
 0x82c   :  { %v2322_v11 = vpack.c.bf16 %v2291_v9, %v2290_v8 }
 0x82e   :  { %3701 = vmatprep.mubr.msk.bf16.mxu1 %vm886_vm2, %v2322_v11 }
 0x82f   :  { %3702 = vmatmul.mubr.msk.bf16.vlgmr.msra.gmra.mxu1 %vm886_vm2, %v2323_v12 }
 0x831   :  { %v3671_v13 = vpop.f32.mrf.mxu1 }
 0x832   :  { %v2188_v21 = vadd.f32 %v3671_v13, %v4564_v42 }
 0x833   :  { %v2179_v14 = vpop.f32.mrf.mxu1 }
 0x834   :  { %v2180_v16 = vadd.f32 %v4564_v42, %v2179_v14  ;;  %v2296_v1 = vmax.f32 %v2188_v21, 0.0 }
 0x835   :  { %v3672_v15 = vpop.f32.mrf.mxu1 }
 0x836   :  { %v2191_v19 = vadd.f32 %v3672_v15, %v4564_v42  ;;  %v2294_v30 = vmax.f32 %v2180_v16, 0.0 }
 0x837   :  { %v2182_v61 = vpop.f32.mrf.mxu1 }
 0x838   :  { %v2183_v26 = vadd.f32 %v4564_v42, %v2182_v61  ;;  %v2297_v29 = vmax.f32 %v2191_v19, 0.0 }
 0x83a   :  { %v2295_v28 = vmax.f32 %v2183_v26, 0.0  ;;  %v2325_v27 = vpack.c.bf16 %v2297_v29, %v2296_v1 }
 0x83c   :  { %v2324_v40 = vpack.c.bf16 %v2295_v28, %v2294_v30 }
 0x83e   :  { %3705 = vmatprep.mubr.msk.bf16.mxu1 %vm886_vm2, %v2324_v40 }
 0x83f   :  { %3706 = vmatmul.mubr.msk.bf16.gmra.mxu1 %vm886_vm2, %v2325_v27 }
 0x841   :  { %v3675_v48 = vpop.f32.mrf.mxu1 }
 0x842   :  { %v2204_v23 = vadd.f32 %v3675_v48, %v4564_v42 }
 0x843   :  { %v2195_v43 = vpop.f32.mrf.mxu1 }
 0x844   :  { %v2196_v49 = vadd.f32 %v4564_v42, %v2195_v43  ;;  %v2300_v58 = vmax.f32 %v2204_v23, 0.0 }
 0x845   :  { %v3676_v60 = vpop.f32.mrf.mxu1 }
 0x846   :  { %v2207_v25 = vadd.f32 %v3676_v60, %v4564_v42  ;;  %v2298_v47 = vmax.f32 %v2196_v49, 0.0 }
 0x847   :  { %v2198_v62 = vpop.f32.mrf.mxu1 }
 0x848   :  { %v2199_v0 = vadd.f32 %v4564_v42, %v2198_v62  ;;  %v2301_v22 = vmax.f32 %v2207_v25, 0.0 }
 0x84a   :  { %v2299_v46 = vmax.f32 %v2199_v0, 0.0  ;;  %v2327_v52 = vpack.c.bf16 %v2301_v22, %v2300_v58 }
 0x84c   :  { %v2326_v34 = vpack.c.bf16 %v2299_v46, %v2298_v47 }
 0x84e   :  { %3709 = vmatprep.mubr.msk.bf16.mxu1 %vm886_vm2, %v2326_v34 }
 0x84f   :  { %3710 = vmatmul.mubr.msk.bf16.gmra.mxu1 %vm886_vm2, %v2327_v52 }
 0x851   :  { %v3679_v38 = vpop.f32.mrf.mxu1 }
 0x852   :  { %v2220_v2 = vadd.f32 %v3679_v38, %v4564_v42 }
 0x853   :  { %v2211_v33 = vpop.f32.mrf.mxu1 }
 0x854   :  { %v2212_v17 = vadd.f32 %v4564_v42, %v2211_v33  ;;  %v2304_v59 = vmax.f32 %v2220_v2, 0.0 }
 0x855   :  { %v3680_v24 = vpop.f32.mrf.mxu1 }
 0x856   :  { %v2223_v50 = vadd.f32 %v3680_v24, %v4564_v42  ;;  %v2302_v41 = vmax.f32 %v2212_v17, 0.0 }
 0x857   :  { %v2214_v31 = vpop.f32.mrf.mxu1 }
 0x858   :  { %v2215_v63 = vadd.f32 %v4564_v42, %v2214_v31  ;;  %v2305_v20 = vmax.f32 %v2223_v50, 0.0 }
 0x85a   :  { %v2303_v55 = vmax.f32 %v2215_v63, 0.0  ;;  %v2329_v18 = vpack.c.bf16 %v2305_v20, %v2304_v59  ;;  %v4617_v20 = vld [vmem:[%s4735_s14] ss:$0 sm:$0xff] }
 0x85c   :  { %v2328_v4 = vpack.c.bf16 %v2303_v55, %v2302_v41 }
 0x85e   :  { %3713 = vmatprep.mubr.msk.bf16.mxu1 %vm886_vm2, %v2328_v4 }
 0x85f   :  { %3714 = vmatmul.mubr.msk.bf16.gmra.mxu1 %vm886_vm2, %v2329_v18 }
 0x861   :  { %v3683_v45 = vpop.f32.mrf.mxu1 }
 0x862   :  { %v2236_v54 = vadd.f32 %v3683_v45, %v4564_v42 }
 0x863   :  { %v2227_v39 = vpop.f32.mrf.mxu1 }
 0x864   :  { %v2228_v56 = vadd.f32 %v4564_v42, %v2227_v39  ;;  %v2308_v36 = vmax.f32 %v2236_v54, 0.0 }
 0x865   :  { %v3684_v53 = vpop.f32.mrf.mxu1 }
 0x866   :  { %v2239_v37 = vadd.f32 %v3684_v53, %v4564_v42  ;;  %v2306_v57 = vmax.f32 %v2228_v56, 0.0 }
 0x867   :  { %v2230_v7 = vpop.f32.mrf.mxu1 }
 0x868   :  { %v2231_v35 = vadd.f32 %v4564_v42, %v2230_v7  ;;  %v2309_v32 = vmax.f32 %v2239_v37, 0.0 }
 0x86a   :  { %v2307_v51 = vmax.f32 %v2231_v35, 0.0  ;;  %v2331_v3 = vpack.c.bf16 %v2309_v32, %v2308_v36 }
 0x86c   :  { %v2330_v44 = vpack.c.bf16 %v2307_v51, %v2306_v57 }
 0x86e   :  { %3717 = vmatprep.mubr.msk.bf16.mxu1 %vm886_vm2, %v2330_v44 }
 0x86f   :  { %3718 = vmatmul.mubr.msk.bf16.gmra.mxu1 %vm886_vm2, %v2331_v3 }
 0x871   :  { %v3687_v5 = vpop.f32.mrf.mxu1 }
 0x872   :  { %v2252_v11 = vadd.f32 %v3687_v5, %v4564_v42 }
 0x873   :  { %v2243_v6 = vpop.f32.mrf.mxu1 }
 0x874   :  { %v2244_v9 = vadd.f32 %v4564_v42, %v2243_v6  ;;  %v2312_v19 = vmax.f32 %v2252_v11, 0.0 }
 0x875   :  { %v3688_v8 = vpop.f32.mrf.mxu1 }
 0x876   :  { %v2255_v10 = vadd.f32 %v3688_v8, %v4564_v42  ;;  %v2310_v15 = vmax.f32 %v2244_v9, 0.0  ;;  %v3832_v9 = vld [vmem:[%s4792_s5 + $0x4] ss:$8 sps:$4 sm:$0xff]  }
 0x877   :  { %v2246_v12 = vpop.f32.mrf.mxu1  ;;  %2674 = vmatprep.mubr.bf16.mxu0 %v3832_v9 }
 0x878   :  { %v2247_v13 = vadd.f32 %v4564_v42, %v2246_v12  ;;  %v2313_v14 = vmax.f32 %v2255_v10, 0.0 }
 0x87a   :  { %v2311_v16 = vmax.f32 %v2247_v13, 0.0  ;;  %v2333_v61 = vpack.c.bf16 %v2313_v14, %v2312_v19 }
 0x87c   :  { %v2332_v21 = vpack.c.bf16 %v2311_v16, %v2310_v15 }
 0x87e   :  { %3721 = vmatprep.mubr.msk.bf16.mxu1 %vm886_vm2, %v2332_v21 }
 0x87f   :  { %3722 = vmatmul.mubr.msk.bf16.gmra.mxu1 %vm886_vm2, %v2333_v61 }
 0x881   :  { %v3691_v26 = vpop.f32.mrf.mxu1 }
 0x882   :  { %v2268_v40 = vadd.f32 %v3691_v26, %v4564_v42 }
 0x883   :  { %v2259_v29 = vpop.f32.mrf.mxu1 }
 0x884   :  { %v2260_v28 = vadd.f32 %v4564_v42, %v2259_v29  ;;  %v2316_v25 = vmax.f32 %v2268_v40, 0.0 }
 0x885   :  { %v3692_v30 = vpop.f32.mrf.mxu1 }
 0x886   :  { %v2271_v1 = vadd.f32 %v3692_v30, %v4564_v42  ;;  %v2314_v60 = vmax.f32 %v2260_v28, 0.0 }
 0x887   :  { %v2262_v27 = vpop.f32.mrf.mxu1 }
 0x888   :  { %v2263_v48 = vadd.f32 %v4564_v42, %v2262_v27  ;;  %v2317_v43 = vmax.f32 %v2271_v1, 0.0 }
 0x88a   :  { %v2315_v49 = vmax.f32 %v2263_v48, 0.0  ;;  %v2335_v62 = vpack.c.bf16 %v2317_v43, %v2316_v25 }
 0x88c   :  { %v2334_v23 = vpack.c.bf16 %v2315_v49, %v2314_v60 }
 0x88e   :  { %3725 = vmatprep.mubr.msk.bf16.mxu1 %vm886_vm2, %v2334_v23 }
 0x88f   :  { %3726 = vmatmul.mubr.msk.bf16.gmra.mxu1 %vm886_vm2, %v2335_v62 }
 0x891   :  { %v3695_v0 = vpop.f32.mrf.mxu1 }
 0x892   :  { %v2284_v34 = vadd.f32 %v3695_v0, %v4564_v42 }
 0x893   :  { %v2275_v22 = vpop.f32.mrf.mxu1 }
 0x894   :  { %v2276_v46 = vadd.f32 %v4564_v42, %v2275_v22  ;;  %v2320_v50 = vmax.f32 %v2284_v34, 0.0 }
 0x895   :  { %v3696_v47 = vpop.f32.mrf.mxu1 }
 0x896   :  { %v2287_v58 = vadd.f32 %v3696_v47, %v4564_v42  ;;  %v2318_v24 = vmax.f32 %v2276_v46, 0.0 }
 0x897   :  { %v2278_v52 = vpop.f32.mrf.mxu1 }
 0x898   :  { %v2279_v38 = vadd.f32 %v4564_v42, %v2278_v52  ;;  %v2321_v33 = vmax.f32 %v2287_v58, 0.0 }
 0x89a   :  { %v2319_v17 = vmax.f32 %v2279_v38, 0.0  ;;  %v2337_v31 = vpack.c.bf16 %v2321_v33, %v2320_v50 }
 0x89c   :  { %v2336_v2 = vpack.c.bf16 %v2319_v17, %v2318_v24 }
 0x89e   :  { %3729 = vmatprep.mubr.msk.bf16.mxu1 %vm886_vm2, %v2336_v2 }
 0x89f   :  { %3730 = vmatmul.mubr.msk.bf16.gmra.mxu1 %vm886_vm2, %v2337_v31 }
 0x8ef   :  { %v3703_v63 = vpop.f32.mrf.mxu1 }
 0x8f0   :  { %v2452_v55 = vadd.f32 %v3703_v63, %v4617_v20 }
 0x8f1   :  { %v2443_v41 = vpop.f32.mrf.mxu1 }
 0x8f2   :  { %v2444_v59 = vadd.f32 %v4617_v20, %v2443_v41  ;;  %v2572_v45 = vmax.f32 %v2452_v55, 0.0 }
 0x8f3   :  { %v3704_v42 = vpop.f32.mrf.mxu1 }
 0x8f4   :  { %v2455_v4 = vadd.f32 %v3704_v42, %v4617_v20  ;;  %v2570_v56 = vmax.f32 %v2444_v59, 0.0 }
 0x8f5   :  { %v2446_v18 = vpop.f32.mrf.mxu1 }
 0x8f6   :  { %v2573_v39 = vmax.f32 %v2455_v4, 0.0  ;;  %v2447_v53 = vadd.f32 %v4617_v20, %v2446_v18 }
 0x8f8   :  { %v4623_v37 = vpack.c.bf16 %v2573_v39, %v2572_v45  ;;  %v2571_v54 = vmax.f32 %v2447_v53, 0.0 }
 0x8fa   :  { %v4625_v7 = vpack.c.bf16 %v2571_v54, %v2570_v56 }
 0x8ff   :  { %v3707_v35 = vpop.f32.mrf.mxu1 }
 0x900   :  { %v2468_v57 = vadd.f32 %v3707_v35, %v4617_v20 }
 0x901   :  { %v2459_v32 = vpop.f32.mrf.mxu1 }
 0x902   :  { %v2460_v36 = vadd.f32 %v4617_v20, %v2459_v32  ;;  %v2576_v5 = vmax.f32 %v2468_v57, 0.0 }
 0x903   :  { %v3708_v51 = vpop.f32.mrf.mxu1 }
 0x904   :  { %v2471_v44 = vadd.f32 %v3708_v51, %v4617_v20  ;;  %v2574_v10 = vmax.f32 %v2460_v36, 0.0 }
 0x905   :  { %v2462_v3 = vpop.f32.mrf.mxu1 }
 0x906   :  { %v2577_v6 = vmax.f32 %v2471_v44, 0.0  ;;  %v2463_v8 = vadd.f32 %v4617_v20, %v2462_v3 }
 0x908   :  { %v4634_v11 = vpack.c.bf16 %v2577_v6, %v2576_v5  ;;  %v2575_v12 = vmax.f32 %v2463_v8, 0.0 }
 0x90a   :  { %v4636_v13 = vpack.c.bf16 %v2575_v12, %v2574_v10 }
 0x90f   :  { %v3711_v14 = vpop.f32.mrf.mxu1 }
 0x910   :  { %v2484_v32 = vadd.f32 %v3711_v14, %v4617_v20 }
 0x911   :  { %v2475_v15 = vpop.f32.mrf.mxu1 }
 0x912   :  { %v2580_v10 = vmax.f32 %v2484_v32, 0.0  ;;  %v2476_v12 = vadd.f32 %v4617_v20, %v2475_v15 }
 0x913   :  { %v3712_v16 = vpop.f32.mrf.mxu1 }
 0x914   :  { %v2487_v45 = vadd.f32 %v3712_v16, %v4617_v20 }
 0x915   :  { %v2478_v19 = vpop.f32.mrf.mxu1 }
 0x916   :  { %v2581_v44 = vmax.f32 %v2487_v45, 0.0  ;;  %v2479_v3 = vadd.f32 %v4617_v20, %v2478_v19  ;;  %v2578_v19 = vmax.f32 %v2476_v12, 0.0 }
 0x91f   :  { %v3715_v21 = vpop.f32.mrf.mxu1 }
 0x920   :  { %v2500_v58 = vadd.f32 %v3715_v21, %v4617_v20  ;;  %v2607_v21 = vpack.c.bf16 %v2581_v44, %v2580_v10 }
 0x921   :  { %v2491_v61 = vpop.f32.mrf.mxu1 }
 0x922   :  { %v2584_v41 = vmax.f32 %v2500_v58, 0.0  ;;  %v2492_v55 = vadd.f32 %v4617_v20, %v2491_v61  ;;  %v2579_v61 = vmax.f32 %v2479_v3, 0.0 }
 0x923   :  { %v3716_v26 = vpop.f32.mrf.mxu1 }
 0x924   :  { %v2503_v22 = vadd.f32 %v3716_v26, %v4617_v20  ;;  %v2582_v57 = vmax.f32 %v2492_v55, 0.0 }
 0x925   :  { %v2494_v29 = vpop.f32.mrf.mxu1 }
 0x926   :  { %v2585_v33 = vmax.f32 %v2503_v22, 0.0  ;;  %v2495_v24 = vadd.f32 %v4617_v20, %v2494_v29 }
 0x928   :  { %v2609_v39 = vpack.c.bf16 %v2585_v33, %v2584_v41  ;;  %v2583_v53 = vmax.f32 %v2495_v24, 0.0 }
 0x92a   :  { %v2608_v5 = vpack.c.bf16 %v2583_v53, %v2582_v57  ;;  %v3030_v53 = vld [vmem:[%s4737_s16] ss:$0 sm:$0xff] }
 0x92f   :  { %v4638_v30 = vpop.f32.mrf.mxu1 }
 0x931   :  { %v4640_v28 = vpop.f32.mrf.mxu1 }
 0x932   :  { %v2508_v58 = vadd.f32 %v4617_v20, %v4640_v28 }
 0x933   :  { %v4642_v1 = vpop.f32.mrf.mxu1 }
 0x934   :  { %v2519_v15 = vadd.f32 %v4642_v1, %v4617_v20 }
 0x935   :  { %v4644_v40 = vpop.f32.mrf.mxu1 }
 0x93f   :  { %v3723_v27 = vpop.f32.mrf.mxu1 }
 0x940   :  { %v2532_v14 = vadd.f32 %v3723_v27, %v4617_v20 }
 0x941   :  { %v2523_v48 = vpop.f32.mrf.mxu1 }
 0x943   :  { %v3724_v43 = vpop.f32.mrf.mxu1 }
 0x944   :  { %v2535_v6 = vadd.f32 %v3724_v43, %v4617_v20  ;;  %v2524_v43 = vadd.f32 %v4617_v20, %v2523_v48 }
 0x945   :  { %v2526_v60 = vpop.f32.mrf.mxu1 }
 0x946   :  { %v2593_v26 = vmax.f32 %v2535_v6, 0.0  ;;  %v2527_v29 = vadd.f32 %v4617_v20, %v2526_v60  ;;  %v2590_v22 = vmax.f32 %v2524_v43, 0.0  ;;  %v2589_v60 = vmax.f32 %v2519_v15, 0.0 }
 0x948   :  { %v2591_v27 = vmax.f32 %v2527_v29, 0.0 }
 0x94f   :  { %v3727_v49 = vpop.f32.mrf.mxu1 }
 0x950   :  { %v2548_v42 = vadd.f32 %v3727_v49, %v4617_v20 }
 0x951   :  { %v2539_v25 = vpop.f32.mrf.mxu1 }
 0x952   :  { %v2596_v51 = vmax.f32 %v2548_v42, 0.0  ;;  %v2540_v36 = vadd.f32 %v4617_v20, %v2539_v25  ;;  %v2592_v25 = vmax.f32 %v2532_v14, 0.0 }
 0x953   :  { %v3728_v23 = vpop.f32.mrf.mxu1 }
 0x954   :  { %v2551_v50 = vadd.f32 %v3728_v23, %v4617_v20  ;;  %v2594_v16 = vmax.f32 %v2540_v36, 0.0  ;;  %v2606_v23 = vpack.c.bf16 %v2579_v61, %v2578_v19 }
 0x955   :  { %v2542_v62 = vpop.f32.mrf.mxu1 }
 0x956   :  { %v2597_v56 = vmax.f32 %v2551_v50, 0.0  ;;  %v2543_v54 = vadd.f32 %v4617_v20, %v2542_v62  ;;  %v2613_v62 = vpack.c.bf16 %v2593_v26, %v2592_v25 }
 0x958   :  { %v2615_v8 = vpack.c.bf16 %v2597_v56, %v2596_v51  ;;  %v2595_v9 = vmax.f32 %v2543_v54, 0.0 }
 0x95a   :  { %v2614_v49 = vpack.c.bf16 %v2595_v9, %v2594_v16  ;;  %v3035_v9 = vld [vmem:[%s4739_s18] ss:$0 sm:$0xff] }
 0x95f   :  { %v3731_v0 = vpop.f32.mrf.mxu1 }
 0x960   :  { %v2564_v46 = vadd.f32 %v3731_v0, %v4617_v20  ;;  %v2516_v0 = vadd.f32 %v4638_v30, %v4617_v20 }
 0x961   :  { %v2555_v47 = vpop.f32.mrf.mxu1 }
 0x962   :  { %v2556_v52 = vadd.f32 %v4617_v20, %v2555_v47  ;;  %v2600_v2 = vmax.f32 %v2564_v46, 0.0  ;;  %v2511_v47 = vadd.f32 %v4617_v20, %v4644_v40  ;;  %v2612_v46 = vpack.c.bf16 %v2591_v27, %v2590_v22  ;;  %v3830_v40 = vld [vmem:[%s4792_s5] ss:$8 sps:$4 sm:$0xff]  }
 0x963   :  { %v3732_v34 = vpop.f32.mrf.mxu1  ;;  %v2588_v48 = vmax.f32 %v2516_v0, 0.0 }
 0x964   :  { %v2567_v38 = vadd.f32 %v3732_v34, %v4617_v20  ;;  %v2598_v59 = vmax.f32 %v2556_v52, 0.0  ;;  %v2587_v34 = vmax.f32 %v2511_v47, 0.0  ;;  %v2586_v52 = vmax.f32 %v2508_v58, 0.0 }
 0x965   :  { %v2558_v17 = vpop.f32.mrf.mxu1  ;;  %v2611_v1 = vpack.c.bf16 %v2589_v60, %v2588_v48 }
 0x966   :  { %v2601_v31 = vmax.f32 %v2567_v38, 0.0  ;;  %v2559_v63 = vadd.f32 %v4617_v20, %v2558_v17  ;;  %v2610_v30 = vpack.c.bf16 %v2587_v34, %v2586_v52  ;;  %v3835_v20 = vld [vmem:[%s4792_s5 + $0x14] ss:$8 sps:$4 sm:$0xff]  }
 0x968   :  { %v2617_v4 = vpack.c.bf16 %v2601_v31, %v2600_v2  ;;  %v2599_v18 = vmax.f32 %v2559_v63, 0.0 }
 0x96a   :  { %v2616_v35 = vpack.c.bf16 %v2599_v18, %v2598_v59  ;;  %3483 = vmatprep.subr.bf16.mxu0 %v2617_v4  ;;  %v3838_v4 = vld [vmem:[%s4738_s17 + $0x8] sm:$0xff]   ;;  %v3839_v18 = vld [vmem:[%s4738_s17] sm:$0xff]  }
 0x96b   :  { %3484 = vmatpush3.bf16.msra.mxu0 %v2609_v39 }
 0x96c   :  { %3485 = vmatprep.subr.bf16.mxu0 %v2616_v35 }
 0x96f   :  { %3486 = vmatpush3.bf16.msra.mxu0 %v2608_v5 }
 0x970   :  { %3487 = vmatprep.subr.bf16.mxu0 %v2615_v8 }
 0x973   :  { %3488 = vmatpush3.bf16.msra.mxu0 %v2607_v21 }
 0x974   :  { %3489 = vmatprep.subr.bf16.mxu0 %v2614_v49 }
 0x977   :  { %3490 = vmatpush3.bf16.msra.mxu0 %v2606_v23 }
 0x978   :  { %3491 = vmatprep.subr.bf16.mxu0 %v2613_v62 }
 0x97b   :  { %3492 = vmatpush3.bf16.msra.mxu0 %v4634_v11  ;;  %v3833_v11 = vld [vmem:[%s4792_s5 + $0x10] ss:$8 sps:$4 sm:$0xff]  }
 0x97c   :  { %3493 = vmatprep.subr.bf16.mxu0 %v2612_v46 }
 0x97f   :  { %3494 = vmatpush3.bf16.msra.mxu0 %v4636_v13 }
 0x980   :  { %3495 = vmatprep.subr.bf16.mxu0 %v2611_v1 }
 0x983   :  { %3496 = vmatpush3.bf16.msra.mxu0 %v4623_v37  ;;  %v3836_v37 = vld [vmem:[%s4736_s15 + $0x8] sm:$0xff]  }
 0x984   :  { %3497 = vmatprep.subr.bf16.mxu0 %v2610_v30 }
 0x987   :  { %3498 = vmatpush3.bf16.msra.mxu0 %v4625_v7  ;;  %v3837_v7 = vld [vmem:[%s4736_s15] sm:$0xff]  }
 0x988   :  { %3733 = vmatprep.subr.bf16.mxu0 %v3836_v37 }
 0x98a   :  { %2675 = vmatmul.mubr.bf16.vlgmr.msra.gmra.mxu0 %v3830_v40 }
 0x98b   :  { %2682 = vmatprep.mubr.bf16.mxu0 %v3835_v20  ;;  %3734 = vmatpush3.bf16.msra.mxu0 %v3836_v37 }
 0x98c   :  { %3735 = vmatprep.subr.bf16.mxu0 %v3837_v7 }
 0x98f   :  { %3736 = vmatpush3.bf16.msra.mxu0 %v3837_v7 }
 0x990   :  { %3741 = vmatprep.subr.bf16.mxu0 %v3838_v4 }
 0x992   :  { %2683 = vmatmul.mubr.bf16.gmra.mxu0 %v3833_v11 }
 0xa4a   :  { %v3499_v13 = vpop.f32.mrf.mxu0 }
 0xa4c   :  { %v3500_v28 = vpop.f32.mrf.mxu0 }
 0xa4d   :  { %v3501_v24 = vadd.f32 %v3500_v28, %v3499_v13 }
 0xa4e   :  { %v3502_v38 = vpop.f32.mrf.mxu0 }
 0xa50   :  { %v3503_v33 = vpop.f32.mrf.mxu0 }
 0xa51   :  { %v3504_v17 = vadd.f32 %v3503_v33, %v3502_v38 }
 0xa52   :  { %v3505_v50 = vpop.f32.mrf.mxu0 }
 0xa53   :  { %v2691_v2 = vpack.c.bf16 %v3504_v17, %v3501_v24 }
 0xa54   :  { %v3506_v31 = vpop.f32.mrf.mxu0 }
 0xa55   :  { %3737 = vmatprep.mubr.msk.bf16.mxu0 %vm886_vm2, %v2691_v2  ;;  %v3507_v55 = vadd.f32 %v3506_v31, %v3505_v50 }
 0xa56   :  { %v3508_v63 = vpop.f32.mrf.mxu0 }
 0xa58   :  { %v3509_v41 = vpop.f32.mrf.mxu0 }
 0xa59   :  { %v3510_v42 = vadd.f32 %v3509_v41, %v3508_v63 }
 0xa5b   :  { %v2692_v59 = vpack.c.bf16 %v3510_v42, %v3507_v55 }
 0xa5d   :  { %3738 = vmatmul.mubr.msk.bf16.vlgmr.msra.gmra.mxu0 %vm886_vm2, %v2692_v59 }
 0xa5e   :  { %3742 = vmatpush3.bf16.msra.mxu0 %v3838_v4 }
 0xa5f   :  { %3743 = vmatprep.subr.bf16.mxu0 %v3839_v18 }
 0xa62   :  { %3744 = vmatpush3.bf16.msra.mxu0 %v3839_v18 }
 0xb1d   :  { %v3739_v45 = vpop.f32.mrf.mxu0 }
 0xb1e   :  { %v2765_v32 = vadd.f32 %v3739_v45, %v3030_v53 }
 0xb1f   :  { %v2756_v39 = vpop.f32.mrf.mxu0 }
 0xb20   :  { %v2757_v54 = vadd.f32 %v3030_v53, %v2756_v39  ;;  %v2773_v5 = vmax.f32 %v2765_v32, 0.0 }
 0xb21   :  { %v3740_v56 = vpop.f32.mrf.mxu0 }
 0xb22   :  { %v2768_v35 = vadd.f32 %v3740_v56, %v3030_v53  ;;  %v2771_v44 = vmax.f32 %v2757_v54, 0.0 }
 0xb23   :  { %v2759_v57 = vpop.f32.mrf.mxu0 }
 0xb24   :  { %v2760_v51 = vadd.f32 %v3030_v53, %v2759_v57  ;;  %v2774_v36 = vmax.f32 %v2768_v35, 0.0 }
 0xb26   :  { %v2772_v3 = vmax.f32 %v2760_v51, 0.0  ;;  %v2776_v8 = vpack.c.bf16 %v2774_v36, %v2773_v5 }
 0xb28   :  { %v2775_v6 = vpack.c.bf16 %v2772_v3, %v2771_v44 }
 0xb2a   :  { %3745 = vmatprep.mubr.msk.bf16.mxu0 %vm886_vm2, %v2775_v6 }
 0xb2b   :  { %3746 = vmatmul.mubr.msk.bf16.vlgmr.msra.gmra.mxu0 %vm886_vm2, %v2776_v8 }
 0xbeb   :  { %v3747_v10 = vpop.f32.mrf.mxu0 }
 0xbec   :  { %v2849_v12 = vadd.f32 %v3747_v10, %v3035_v9 }
 0xbed   :  { %v2840_v14 = vpop.f32.mrf.mxu0 }
 0xbee   :  { %2857 = vst [vmem:[%s4740_s19 + $0x10] sm:$0xff] %v2849_v12  ;;  %v2841_v16 = vadd.f32 %v3035_v9, %v2840_v14 }
 0xbef   :  { %v3748_v21 = vpop.f32.mrf.mxu0 }
 0xbf0   :  { %2855 = vst [vmem:[%s4740_s19] sm:$0xff] %v2841_v16  ;;  %v2852_v61 = vadd.f32 %v3748_v21, %v3035_v9 }
 0xbf1   :  { %v2843_v26 = vpop.f32.mrf.mxu0 }
 0xbf2   :  { %2858 = vst [vmem:[%s4740_s19 + $0x18] sm:$0xff] %v2852_v61  ;;  %v2844_v29 = vadd.f32 %v3035_v9, %v2843_v26 }
 0xbf4   :  { %2856 = vst [vmem:[%s4740_s19 + $0x8] sm:$0xff] %v2844_v29 }
 0xbf5   :  { %2863 = vsyncpa [#allocation3], 1 }
 0xbf6   :  { %2864 = vsyncpa [#allocation5], 1 }
 0xbf7   :  { %2865 = vsyncpa [#allocation8], 1 }

</bundles_post_ra>
